<compile_context>
chip_gen: v7x
topology: tpu7x:2x2x1
jax: 0.10.0
libtpu: 0.0.40
codegen_flags: <defaults>
</compile_context>

<pallas_src>
import functools

import jax
import jax.numpy as jnp
from jax.experimental import pallas as pl
from jax.experimental.pallas import tpu as pltpu


def _round_up(x, m):
    return (x + m - 1) // m * m


def _res_block_kernel(atom_ref, pnbr_ref, bond_ref, ws_ref, wb_ref, b_ref,
                      out_ref, s1_ref, ss1_ref, s2_ref, ss2_ref, nsum_ref,
                      *, n_valid, eps):
    p = pl.program_id(0)   # phase: 0 = bn1 stats, 1 = gate + bn2 stats, 2 = finalize
    t = pl.program_id(1)   # row tile
    tn, A = atom_ref.shape
    M = pnbr_ref.shape[1]
    A2 = pnbr_ref.shape[2]
    B = bond_ref.shape[2]

    inv_c1 = 1.0 / float(n_valid * M)   # bn1 batch size = N*M rows
    inv_c2 = 1.0 / float(n_valid)       # bn2 batch size = N rows

    # mask for padding rows (N is rounded up to a multiple of the tile size)
    row = t * tn + jax.lax.broadcasted_iota(jnp.int32, (tn, 1), 0)
    valid = (row < n_valid).astype(jnp.float32)                       # (tn, 1)

    def compute_gated():
        # fc_full split into three K-blocks; self & bond GEMMs run here, the
        # neighbor half arrives pre-projected (and gathered) via pnbr_ref.
        atom = atom_ref[...]                                           # (tn, A) f32
        proj_self = jnp.dot(atom, ws_ref[...],
                            preferred_element_type=jnp.float32)        # (tn, A2)
        bond = bond_ref[...].reshape(tn * M, B)
        proj_bond = jnp.dot(bond, wb_ref[...],
                            preferred_element_type=jnp.float32)        # (tn*M, A2)
        gated = (proj_self[:, None, :]
                 + pnbr_ref[...].astype(jnp.float32)
                 + proj_bond.reshape(tn, M, A2)
                 + b_ref[...][None])                                   # (tn, M, A2)
        return gated

    # ---------- phase 0: accumulate bn1 batch statistics (sum / sum-of-squares)
    @pl.when(jnp.logical_and(p == 0, t == 0))
    def _init_bn1():
        s1_ref[...] = jnp.zeros_like(s1_ref)
        ss1_ref[...] = jnp.zeros_like(ss1_ref)

    @pl.when(p == 0)
    def _phase0():
        g = (compute_gated() * valid[:, :, None]).reshape(tn * M, A2)
        s1_ref[...] += jnp.sum(g, axis=0, keepdims=True)
        ss1_ref[...] += jnp.sum(g * g, axis=0, keepdims=True)

    # ---------- phase 1: bn1-normalize, gate, reduce over neighbors, bn2 stats
    @pl.when(jnp.logical_and(p == 1, t == 0))
    def _init_bn2():
        s2_ref[...] = jnp.zeros_like(s2_ref)
        ss2_ref[...] = jnp.zeros_like(ss2_ref)

    @pl.when(p == 1)
    def _phase1():
        mu1 = s1_ref[...] * inv_c1                                     # (1, A2)
        var1 = ss1_ref[...] * inv_c1 - mu1 * mu1
        inv1 = jax.lax.rsqrt(var1 + eps)
        # TODO(synk): for small graphs the phase-0 gated tensor could be cached in
        # a (n_pad, M, A2) VMEM scratch instead of being recomputed here.
        gated = (compute_gated() - mu1[None]) * inv1[None]             # (tn, M, A2)
        nbr_filter = jax.nn.sigmoid(gated[:, :, :A])
        nbr_core = jax.nn.softplus(gated[:, :, A:])
        nsum = jnp.sum(nbr_filter * nbr_core, axis=1)                  # (tn, A)
        start = pl.multiple_of(t * tn, 8)
        nsum_ref[pl.ds(start, tn), :] = nsum                           # stash pre-bn2
        nm = nsum * valid
        s2_ref[...] += jnp.sum(nm, axis=0, keepdims=True)
        ss2_ref[...] += jnp.sum(nm * nm, axis=0, keepdims=True)

    # ---------- phase 2: bn2-normalize, residual adds, softplus, write out
    @pl.when(p == 2)
    def _phase2():
        mu2 = s2_ref[...] * inv_c2                                     # (1, A)
        var2 = ss2_ref[...] * inv_c2 - mu2 * mu2
        inv2 = jax.lax.rsqrt(var2 + eps)
        start = pl.multiple_of(t * tn, 8)
        nsum = (nsum_ref[pl.ds(start, tn), :] - mu2) * inv2            # (tn, A)
        atom = atom_ref[...]
        conv = jax.nn.softplus(atom + nsum)                            # ConvLayer output
        out_ref[...] = jax.nn.softplus(conv + atom).astype(out_ref.dtype)  # Res_block


def res_block(atom_fea, nbr_fea, nbr_fea_idx, w, b, *, tile_n=256,
              compute_dtype=jnp.float32):
    """w: (2A+B, 2A) = fc_full.weight.T ; b: (2A,) = fc_full.bias"""
    N, A = atom_fea.shape
    M = nbr_fea_idx.shape[1]
    B = nbr_fea.shape[2]
    A2 = 2 * A
    assert w.shape == (A2 + B, A2) and b.shape == (A2,)

    atom_fea = atom_fea.astype(jnp.float32)
    w = w.astype(jnp.float32)
    w_self, w_nbr, w_bond = w[:A], w[A:A2], w[A2:]

    # Project-before-gather: the neighbor half of fc_full is applied once per atom,
    # then gathered -- M x fewer MXU flops than gathering raw features and
    # re-projecting every neighbor copy.
    prec = jax.lax.Precision.HIGHEST if compute_dtype == jnp.float32 else None
    proj_nbr = jnp.dot(atom_fea.astype(compute_dtype), w_nbr.astype(compute_dtype),
                       preferred_element_type=jnp.float32, precision=prec)
    # TODO(synk): move this gather in-kernel (scalar-prefetch nbr_fea_idx + per-row
    # DMA / pl.Element index_map) to avoid materializing the (N, M, 2A) gather
    # output in HBM.
    proj_nbr_g = proj_nbr[nbr_fea_idx].astype(compute_dtype)           # (N, M, 2A)
    bond = nbr_fea.astype(compute_dtype)

    # Row tiling. BN stats stay global: the 3-phase grid in the kernel handles it.
    tn = min(_round_up(tile_n, 8), _round_up(N, 8))
    n_pad = _round_up(N, tn)
    nt = n_pad // tn
    pad = n_pad - N
    if pad:
        atom_p = jnp.pad(atom_fea, ((0, pad), (0, 0)))
        pnbr_p = jnp.pad(proj_nbr_g, ((0, pad), (0, 0), (0, 0)))
        bond_p = jnp.pad(bond, ((0, pad), (0, 0), (0, 0)))
    else:
        atom_p, pnbr_p, bond_p = atom_fea, proj_nbr_g, bond

    kernel = functools.partial(_res_block_kernel, n_valid=N, eps=1e-5)

    grid_spec = pltpu.PrefetchScalarGridSpec(
        num_scalar_prefetch=0,
        grid=(3, nt),   # (phase, row tile); phase is the slowest-varying axis
        in_specs=[
            pl.BlockSpec((tn, A), lambda p, t: (t, 0)),                       # atom
            pl.BlockSpec((tn, M, A2),                                          # projected+gathered nbrs
                         lambda p, t: (jnp.where(p < 2, t, 0), 0, 0)),
            pl.BlockSpec((tn, M, B),                                           # bond features
                         lambda p, t: (jnp.where(p < 2, t, 0), 0, 0)),
            pl.BlockSpec((A, A2), lambda p, t: (0, 0)),                        # W_self
            pl.BlockSpec((B, A2), lambda p, t: (0, 0)),                        # W_bond
            pl.BlockSpec((1, A2), lambda p, t: (0, 0)),                        # bias
        ],
        # output tiles are only produced in phase 2 -> each tile stored exactly once
        out_specs=pl.BlockSpec((tn, A), lambda p, t: (jnp.where(p == 2, t, 0), 0)),
        scratch_shapes=[
            pltpu.VMEM((1, A2), jnp.float32),     # bn1 sum
            pltpu.VMEM((1, A2), jnp.float32),     # bn1 sum of squares
            pltpu.VMEM((1, A), jnp.float32),      # bn2 sum
            pltpu.VMEM((1, A), jnp.float32),      # bn2 sum of squares
            pltpu.VMEM((n_pad, A), jnp.float32),  # pre-bn2 neighbor sums (per atom)
            # TODO(synk): for very large graphs spill this (n_pad, A) buffer to HBM
            # (extra output + third pass input) instead of holding it in VMEM.
        ],
    )

    out = pl.pallas_call(
        kernel,
        grid_spec=grid_spec,
        out_shape=jax.ShapeDtypeStruct((n_pad, A), jnp.float32),
        compiler_params=pltpu.CompilerParams(
            # phase axis and row axis both carry cross-step state (BN scratch),
            # so they must stay sequential on one core.
            dimension_semantics=("arbitrary", "arbitrary")),
    )(atom_p, pnbr_p, bond_p, w_self, w_bond.astype(compute_dtype),
      b.reshape(1, A2))
    return out[:N]


def res_block_reference(atom_fea, nbr_fea, nbr_fea_idx, w, b):
    """Pure-JAX mirror of the PyTorch forward (training-mode BN, f32)."""
    N, M = nbr_fea_idx.shape
    A = atom_fea.shape[1]
    eps = 1e-5
    atom_nbr = atom_fea[nbr_fea_idx]
    total = jnp.concatenate(
        [jnp.broadcast_to(atom_fea[:, None, :], (N, M, A)), atom_nbr, nbr_fea], axis=2)
    gated = jnp.dot(total.reshape(N * M, -1), w,
                    precision=jax.lax.Precision.HIGHEST) + b
    gated = (gated - gated.mean(0)) / jnp.sqrt(gated.var(0) + eps)
    gated = gated.reshape(N, M, 2 * A)
    f = jax.nn.sigmoid(gated[..., :A])
    c = jax.nn.softplus(gated[..., A:])
    s = jnp.sum(f * c, axis=1)
    s = (s - s.mean(0)) / jnp.sqrt(s.var(0) + eps)
    conv = jax.nn.softplus(atom_fea + s)
    return jax.nn.softplus(conv + atom_fea)


if __name__ == "__main__":
    # Small, module-consistent shapes. N deliberately not a multiple of the tile
    # so the padded-row masking of the BN statistics is exercised.
    N, M = 20, 4              # atoms, neighbors per atom
    A, B = 64, 32             # atom_fea_len (module default), nbr_fea_len

    key = jax.random.PRNGKey(0)
    k1, k2, k3, k4, k5 = jax.random.split(key, 5)

    atom_fea = jax.random.normal(k1, (N, A), dtype=jnp.float32)
    nbr_fea = jax.random.normal(k2, (N, M, B), dtype=jnp.float32)
    nbr_fea_idx = jax.random.randint(k3, (N, M), 0, N, dtype=jnp.int32)

    # fc_full = nn.Linear(2A+B, 2A); U(-1/sqrt(fan_in), 1/sqrt(fan_in))
    fan_in = 2 * A + B
    bound = 1.0 / (fan_in ** 0.5)
    w = jax.random.uniform(k4, (fan_in, 2 * A), minval=-bound, maxval=bound,
                           dtype=jnp.float32)       # stored as weight.T
    b = jax.random.uniform(k5, (2 * A,), minval=-bound, maxval=bound,
                           dtype=jnp.float32)

    ref = jax.block_until_ready(
        res_block_reference(atom_fea, nbr_fea, nbr_fea_idx, w, b))

    # f32 path, small tile: 3 row tiles of 8 rows (multi-tile + padded-row
    # masking of the BN statistics exercised).
    out = jax.block_until_ready(
        res_block(atom_fea, nbr_fea, nbr_fea_idx, w, b, tile_n=8))
    assert out.shape == (N, A) and out.dtype == jnp.float32
    err = jnp.max(jnp.abs(out - ref))
    assert jnp.allclose(out, ref, atol=2e-3, rtol=2e-3), \
        f"f32 (tile_n=8) mismatch: max abs err {err}"

    # f32 path, default tile (single row tile covering the whole padded batch).
    out_big = jax.block_until_ready(
        res_block(atom_fea, nbr_fea, nbr_fea_idx, w, b))
    err_big = jnp.max(jnp.abs(out_big - ref))
    assert jnp.allclose(out_big, ref, atol=2e-3, rtol=2e-3), \
        f"f32 (default tile) mismatch: max abs err {err_big}"

    # bf16-GEMM-input path (BN stats / activations stay f32). BN's 1/std can
    # amplify bf16 rounding, hence the looser tolerance.
    out_bf16 = jax.block_until_ready(
        res_block(atom_fea, nbr_fea, nbr_fea_idx, w, b, tile_n=8,
                  compute_dtype=jnp.bfloat16))
    err16 = jnp.max(jnp.abs(out_bf16 - ref))
    assert jnp.allclose(out_bf16, ref, atol=1.5e-1, rtol=1.5e-1), \
        f"bf16 mismatch: max abs err {err16}"

    print("KERNEL_OK")
</pallas_src>

<mosaic_0001>
module attributes {stable_mosaic.version = 11 : i64} {
  func.func @_res_block_kernel(%arg0: i32, %arg1: i32, %arg2: memref<8x64xf32, #tpu.memory_space<vmem>>, %arg3: memref<8x4x128xf32, #tpu.memory_space<vmem>>, %arg4: memref<8x4x32xf32, #tpu.memory_space<vmem>>, %arg5: memref<64x128xf32, #tpu.memory_space<vmem>>, %arg6: memref<32x128xf32, #tpu.memory_space<vmem>>, %arg7: memref<1x128xf32, #tpu.memory_space<vmem>>, %arg8: memref<8x64xf32, #tpu.memory_space<vmem>>, %arg9: memref<1x128xf32, #tpu.memory_space<vmem>>, %arg10: memref<1x128xf32, #tpu.memory_space<vmem>>, %arg11: memref<1x64xf32, #tpu.memory_space<vmem>>, %arg12: memref<1x64xf32, #tpu.memory_space<vmem>>, %arg13: memref<24x64xf32, #tpu.memory_space<vmem>>) attributes {dimension_semantics = [#tpu.dimension_semantics<arbitrary>, #tpu.dimension_semantics<arbitrary>], iteration_bounds = array<i64: 3, 3>, scalar_prefetch = 0 : i64, scratch_operands = 5 : i64, tpu.core_type = #tpu.core_type<tc>, window_params = [{transform_indices = @transform_0, window_bounds = array<i64: 8, 64>}, {transform_indices = @transform_1, window_bounds = array<i64: 8, 4, 128>}, {transform_indices = @transform_2, window_bounds = array<i64: 8, 4, 32>}, {pipeline_mode = #tpu.pipeline_mode<synchronous>, transform_indices = @transform_3, window_bounds = array<i64: 64, 128>}, {pipeline_mode = #tpu.pipeline_mode<synchronous>, transform_indices = @transform_4, window_bounds = array<i64: 32, 128>}, {pipeline_mode = #tpu.pipeline_mode<synchronous>, transform_indices = @transform_5, window_bounds = array<i64: 1, 128>}, {transform_indices = @transform_6, window_bounds = array<i64: 8, 64>}]} {
    %c8_i32 = arith.constant 8 : i32
    %0 = arith.muli %arg1, %c8_i32 : i32
    %1 = tpu.iota {dimensions = array<i32: 0>} : vector<8x1xi32>
    %2 = vector.broadcast %0 : i32 to vector<8x1xi32>
    %3 = arith.addi %2, %1 : vector<8x1xi32>
    %c20_i32 = arith.constant 20 : i32
    %4 = vector.broadcast %c20_i32 : i32 to vector<8x1xi32>
    %5 = arith.cmpi slt, %3, %4 : vector<8x1xi32>
    %6 = arith.extui %5 : vector<8x1xi1> to vector<8x1xi32>
    %7 = arith.sitofp %6 : vector<8x1xi32> to vector<8x1xf32>
    %c0_i32 = arith.constant 0 : i32
    %8 = arith.cmpi eq, %arg0, %c0_i32 : i32
    %c0_i32_0 = arith.constant 0 : i32
    %9 = arith.cmpi eq, %arg1, %c0_i32_0 : i32
    %10 = arith.andi %8, %9 : i1
    %11 = arith.extui %10 : i1 to i32
    %c0_i32_1 = arith.constant 0 : i32
    %12 = arith.cmpi ne, %11, %c0_i32_1 : i32
    scf.if %12 {
      %cst = arith.constant 0.000000e+00 : f32
      %27 = vector.broadcast %cst : f32 to vector<1x128xf32>
      %c0 = arith.constant 0 : index
      %c0_9 = arith.constant 0 : index
      %28 = vector.load %arg9[%c0, %c0_9] : memref<1x128xf32, #tpu.memory_space<vmem>>, vector<1x128xf32>
      tpu.vector_store %arg9[%c0, %c0_9], %27 {strides = array<i32>} : memref<1x128xf32, #tpu.memory_space<vmem>>, vector<1x128xf32>,
      %cst_10 = arith.constant 0.000000e+00 : f32
      %29 = vector.broadcast %cst_10 : f32 to vector<1x128xf32>
      %c0_11 = arith.constant 0 : index
      %c0_12 = arith.constant 0 : index
      %30 = vector.load %arg10[%c0_11, %c0_12] : memref<1x128xf32, #tpu.memory_space<vmem>>, vector<1x128xf32>
      tpu.vector_store %arg10[%c0_11, %c0_12], %29 {strides = array<i32>} : memref<1x128xf32, #tpu.memory_space<vmem>>, vector<1x128xf32>,
    } else {
    }
    %c0_i32_2 = arith.constant 0 : i32
    %13 = arith.cmpi eq, %arg0, %c0_i32_2 : i32
    %14 = arith.extui %13 : i1 to i32
    %c0_i32_3 = arith.constant 0 : i32
    %15 = arith.cmpi ne, %14, %c0_i32_3 : i32
    scf.if %15 {
      %c0 = arith.constant 0 : index
      %c0_9 = arith.constant 0 : index
      %27 = vector.load %arg2[%c0, %c0_9] : memref<8x64xf32, #tpu.memory_space<vmem>>, vector<8x64xf32>
      %c0_10 = arith.constant 0 : index
      %c0_11 = arith.constant 0 : index
      %28 = vector.load %arg5[%c0_10, %c0_11] : memref<64x128xf32, #tpu.memory_space<vmem>>, vector<64x128xf32>
      %cst = arith.constant dense<0.000000e+00> : vector<8x128xf32>
      %29 = tpu.matmul %27, %28, %cst {dimension_numbers = #tpu.dot_dimension_numbers<[1], [0], [0], [1], [0, 0, 1, 1], [], []>} : vector<8x64xf32>, vector<64x128xf32>, vector<8x128xf32> -> vector<8x128xf32>
      %c0_12 = arith.constant 0 : index
      %c0_13 = arith.constant 0 : index
      %c0_14 = arith.constant 0 : index
      %30 = vector.load %arg4[%c0_12, %c0_13, %c0_14] : memref<8x4x32xf32, #tpu.memory_space<vmem>>, vector<8x4x32xf32>
      %31 = vector.shape_cast %30 : vector<8x4x32xf32> to vector<32x32xf32>
      %c0_15 = arith.constant 0 : index
      %c0_16 = arith.constant 0 : index
      %32 = vector.load %arg6[%c0_15, %c0_16] : memref<32x128xf32, #tpu.memory_space<vmem>>, vector<32x128xf32>
      %cst_17 = arith.constant dense<0.000000e+00> : vector<32x128xf32>
      %33 = tpu.matmul %31, %32, %cst_17 {dimension_numbers = #tpu.dot_dimension_numbers<[1], [0], [0], [1], [0, 0, 1, 1], [], []>} : vector<32x32xf32>, vector<32x128xf32>, vector<32x128xf32> -> vector<32x128xf32>
      %34 = vector.shape_cast %29 : vector<8x128xf32> to vector<8x1x128xf32>
      %c0_18 = arith.constant 0 : index
      %c0_19 = arith.constant 0 : index
      %c0_20 = arith.constant 0 : index
      %35 = vector.load %arg3[%c0_18, %c0_19, %c0_20] : memref<8x4x128xf32, #tpu.memory_space<vmem>>, vector<8x4x128xf32>
      %36 = vector.broadcast %34 : vector<8x1x128xf32> to vector<8x4x128xf32>
      %37 = arith.addf %36, %35 : vector<8x4x128xf32>
      %38 = vector.shape_cast %33 : vector<32x128xf32> to vector<8x4x128xf32>
      %39 = arith.addf %37, %38 : vector<8x4x128xf32>
      %c0_21 = arith.constant 0 : index
      %c0_22 = arith.constant 0 : index
      %40 = vector.load %arg7[%c0_21, %c0_22] : memref<1x128xf32, #tpu.memory_space<vmem>>, vector<1x128xf32>
      %41 = vector.shape_cast %40 : vector<1x128xf32> to vector<1x1x128xf32>
      %42 = vector.broadcast %41 : vector<1x1x128xf32> to vector<8x4x128xf32>
      %43 = arith.addf %39, %42 : vector<8x4x128xf32>
      %44 = vector.shape_cast %7 : vector<8x1xf32> to vector<8x1x1xf32>
      %45 = vector.broadcast %44 : vector<8x1x1xf32> to vector<8x4x128xf32>
      %46 = arith.mulf %43, %45 : vector<8x4x128xf32>
      %47 = vector.shape_cast %46 : vector<8x4x128xf32> to vector<32x128xf32>
      %c0_23 = arith.constant 0 : index
      %c0_24 = arith.constant 0 : index
      %48 = vector.load %arg9[%c0_23, %c0_24] : memref<1x128xf32, #tpu.memory_space<vmem>>, vector<1x128xf32>
      %cst_25 = arith.constant dense<0.000000e+00> : vector<128xf32>
      %49 = vector.multi_reduction <add>, %47, %cst_25 [0] : vector<32x128xf32> to vector<128xf32>
      %50 = vector.shape_cast %49 : vector<128xf32> to vector<1x128xf32>
      %51 = arith.addf %48, %50 : vector<1x128xf32>
      %c0_26 = arith.constant 0 : index
      %c0_27 = arith.constant 0 : index
      %52 = vector.load %arg9[%c0_26, %c0_27] : memref<1x128xf32, #tpu.memory_space<vmem>>, vector<1x128xf32>
      tpu.vector_store %arg9[%c0_26, %c0_27], %51 {strides = array<i32>} : memref<1x128xf32, #tpu.memory_space<vmem>>, vector<1x128xf32>,
      %c0_28 = arith.constant 0 : index
      %c0_29 = arith.constant 0 : index
      %53 = vector.load %arg10[%c0_28, %c0_29] : memref<1x128xf32, #tpu.memory_space<vmem>>, vector<1x128xf32>
      %54 = arith.mulf %47, %47 : vector<32x128xf32>
      %cst_30 = arith.constant dense<0.000000e+00> : vector<128xf32>
      %55 = vector.multi_reduction <add>, %54, %cst_30 [0] : vector<32x128xf32> to vector<128xf32>
      %56 = vector.shape_cast %55 : vector<128xf32> to vector<1x128xf32>
      %57 = arith.addf %53, %56 : vector<1x128xf32>
      %c0_31 = arith.constant 0 : index
      %c0_32 = arith.constant 0 : index
      %58 = vector.load %arg10[%c0_31, %c0_32] : memref<1x128xf32, #tpu.memory_space<vmem>>, vector<1x128xf32>
      tpu.vector_store %arg10[%c0_31, %c0_32], %57 {strides = array<i32>} : memref<1x128xf32, #tpu.memory_space<vmem>>, vector<1x128xf32>,
    } else {
    }
    %c1_i32 = arith.constant 1 : i32
    %16 = arith.cmpi eq, %arg0, %c1_i32 : i32
    %c0_i32_4 = arith.constant 0 : i32
    %17 = arith.cmpi eq, %arg1, %c0_i32_4 : i32
    %18 = arith.andi %16, %17 : i1
    %19 = arith.extui %18 : i1 to i32
    %c0_i32_5 = arith.constant 0 : i32
    %20 = arith.cmpi ne, %19, %c0_i32_5 : i32
    scf.if %20 {
      %cst = arith.constant 0.000000e+00 : f32
      %27 = vector.broadcast %cst : f32 to vector<1x64xf32>
      %c0 = arith.constant 0 : index
      %c0_9 = arith.constant 0 : index
      %28 = vector.load %arg11[%c0, %c0_9] : memref<1x64xf32, #tpu.memory_space<vmem>>, vector<1x64xf32>
      tpu.vector_store %arg11[%c0, %c0_9], %27 {strides = array<i32>} : memref<1x64xf32, #tpu.memory_space<vmem>>, vector<1x64xf32>,
      %cst_10 = arith.constant 0.000000e+00 : f32
      %29 = vector.broadcast %cst_10 : f32 to vector<1x64xf32>
      %c0_11 = arith.constant 0 : index
      %c0_12 = arith.constant 0 : index
      %30 = vector.load %arg12[%c0_11, %c0_12] : memref<1x64xf32, #tpu.memory_space<vmem>>, vector<1x64xf32>
      tpu.vector_store %arg12[%c0_11, %c0_12], %29 {strides = array<i32>} : memref<1x64xf32, #tpu.memory_space<vmem>>, vector<1x64xf32>,
    } else {
    }
    %c1_i32_6 = arith.constant 1 : i32
    %21 = arith.cmpi eq, %arg0, %c1_i32_6 : i32
    %22 = arith.extui %21 : i1 to i32
    %c0_i32_7 = arith.constant 0 : i32
    %23 = arith.cmpi ne, %22, %c0_i32_7 : i32
    scf.if %23 {
      %c0 = arith.constant 0 : index
      %c0_9 = arith.constant 0 : index
      %27 = vector.load %arg9[%c0, %c0_9] : memref<1x128xf32, #tpu.memory_space<vmem>>, vector<1x128xf32>
      %cst = arith.constant 1.250000e-02 : f32
      %28 = vector.broadcast %cst : f32 to vector<1x128xf32>
      %29 = arith.mulf %27, %28 : vector<1x128xf32>
      %c0_10 = arith.constant 0 : index
      %c0_11 = arith.constant 0 : index
      %30 = vector.load %arg10[%c0_10, %c0_11] : memref<1x128xf32, #tpu.memory_space<vmem>>, vector<1x128xf32>
      %cst_12 = arith.constant 1.250000e-02 : f32
      %31 = vector.broadcast %cst_12 : f32 to vector<1x128xf32>
      %32 = arith.mulf %30, %31 : vector<1x128xf32>
      %33 = arith.mulf %29, %29 : vector<1x128xf32>
      %34 = arith.subf %32, %33 : vector<1x128xf32>
      %cst_13 = arith.constant 9.99999974E-6 : f32
      %35 = vector.broadcast %cst_13 : f32 to vector<1x128xf32>
      %36 = arith.addf %34, %35 : vector<1x128xf32>
      %37 = math.rsqrt %36 : vector<1x128xf32>
      %c0_14 = arith.constant 0 : index
      %c0_15 = arith.constant 0 : index
      %38 = vector.load %arg2[%c0_14, %c0_15] : memref<8x64xf32, #tpu.memory_space<vmem>>, vector<8x64xf32>
      %c0_16 = arith.constant 0 : index
      %c0_17 = arith.constant 0 : index
      %39 = vector.load %arg5[%c0_16, %c0_17] : memref<64x128xf32, #tpu.memory_space<vmem>>, vector<64x128xf32>
      %cst_18 = arith.constant dense<0.000000e+00> : vector<8x128xf32>
      %40 = tpu.matmul %38, %39, %cst_18 {dimension_numbers = #tpu.dot_dimension_numbers<[1], [0], [0], [1], [0, 0, 1, 1], [], []>} : vector<8x64xf32>, vector<64x128xf32>, vector<8x128xf32> -> vector<8x128xf32>
      %c0_19 = arith.constant 0 : index
      %c0_20 = arith.constant 0 : index
      %c0_21 = arith.constant 0 : index
      %41 = vector.load %arg4[%c0_19, %c0_20, %c0_21] : memref<8x4x32xf32, #tpu.memory_space<vmem>>, vector<8x4x32xf32>
      %42 = vector.shape_cast %41 : vector<8x4x32xf32> to vector<32x32xf32>
      %c0_22 = arith.constant 0 : index
      %c0_23 = arith.constant 0 : index
      %43 = vector.load %arg6[%c0_22, %c0_23] : memref<32x128xf32, #tpu.memory_space<vmem>>, vector<32x128xf32>
      %cst_24 = arith.constant dense<0.000000e+00> : vector<32x128xf32>
      %44 = tpu.matmul %42, %43, %cst_24 {dimension_numbers = #tpu.dot_dimension_numbers<[1], [0], [0], [1], [0, 0, 1, 1], [], []>} : vector<32x32xf32>, vector<32x128xf32>, vector<32x128xf32> -> vector<32x128xf32>
      %45 = vector.shape_cast %40 : vector<8x128xf32> to vector<8x1x128xf32>
      %c0_25 = arith.constant 0 : index
      %c0_26 = arith.constant 0 : index
      %c0_27 = arith.constant 0 : index
      %46 = vector.load %arg3[%c0_25, %c0_26, %c0_27] : memref<8x4x128xf32, #tpu.memory_space<vmem>>, vector<8x4x128xf32>
      %47 = vector.broadcast %45 : vector<8x1x128xf32> to vector<8x4x128xf32>
      %48 = arith.addf %47, %46 : vector<8x4x128xf32>
      %49 = vector.shape_cast %44 : vector<32x128xf32> to vector<8x4x128xf32>
      %50 = arith.addf %48, %49 : vector<8x4x128xf32>
      %c0_28 = arith.constant 0 : index
      %c0_29 = arith.constant 0 : index
      %51 = vector.load %arg7[%c0_28, %c0_29] : memref<1x128xf32, #tpu.memory_space<vmem>>, vector<1x128xf32>
      %52 = vector.shape_cast %51 : vector<1x128xf32> to vector<1x1x128xf32>
      %53 = vector.broadcast %52 : vector<1x1x128xf32> to vector<8x4x128xf32>
      %54 = arith.addf %50, %53 : vector<8x4x128xf32>
      %55 = vector.shape_cast %29 : vector<1x128xf32> to vector<1x1x128xf32>
      %56 = vector.broadcast %55 : vector<1x1x128xf32> to vector<8x4x128xf32>
      %57 = arith.subf %54, %56 : vector<8x4x128xf32>
      %58 = vector.shape_cast %37 : vector<1x128xf32> to vector<1x1x128xf32>
      %59 = vector.broadcast %58 : vector<1x1x128xf32> to vector<8x4x128xf32>
      %60 = arith.mulf %57, %59 : vector<8x4x128xf32>
      %61 = vector.extract_strided_slice %60 {offsets = [0, 0, 0], sizes = [8, 4, 64], strides = [1, 1, 1]} : vector<8x4x128xf32> to vector<8x4x64xf32>
      %62 = arith.negf %61 : vector<8x4x64xf32>
      %63 = math.exp %62 : vector<8x4x64xf32>
      %cst_30 = arith.constant 1.000000e+00 : f32
      %64 = vector.broadcast %cst_30 : f32 to vector<8x4x64xf32>
      %65 = arith.addf %64, %63 : vector<8x4x64xf32>
      %66 = arith.divf %64, %65 : vector<8x4x64xf32>
      %67 = vector.extract_strided_slice %60 {offsets = [0, 0, 64], sizes = [8, 4, 64], strides = [1, 1, 1]} : vector<8x4x128xf32> to vector<8x4x64xf32>
      %cst_31 = arith.constant 0.000000e+00 : f32
      %68 = vector.broadcast %cst_31 : f32 to vector<8x4x64xf32>
      %69 = arith.maximumf %67, %68 : vector<8x4x64xf32>
      %70 = vector.broadcast %cst_31 : f32 to vector<8x4x64xf32>
      %71 = arith.subf %67, %70 : vector<8x4x64xf32>
      %72 = arith.cmpf one, %71, %71 : vector<8x4x64xf32>
      %73 = vector.broadcast %cst_31 : f32 to vector<8x4x64xf32>
      %74 = arith.addf %67, %73 : vector<8x4x64xf32>
      %75 = math.absf %71 : vector<8x4x64xf32>
      %cst_32 = arith.constant 0.000000e+00 : f32
      %76 = vector.broadcast %cst_32 : f32 to vector<8x4x64xf32>
      %77 = arith.subf %76, %75 : vector<8x4x64xf32>
      %78 = math.exp %77 : vector<8x4x64xf32>
      %79 = math.log1p %78 : vector<8x4x64xf32>
      %80 = arith.addf %69, %79 : vector<8x4x64xf32>
      %81 = arith.select %72, %74, %80 : vector<8x4x64xi1>, vector<8x4x64xf32>
      %82 = arith.mulf %66, %81 : vector<8x4x64xf32>
      %cst_33 = arith.constant dense<0.000000e+00> : vector<8x64xf32>
      %83 = vector.multi_reduction <add>, %82, %cst_33 [1] : vector<8x4x64xf32> to vector<8x64xf32>
      %c8_i32_34 = arith.constant 8 : i32
      %84 = arith.muli %arg1, %c8_i32_34 : i32
      %85 = tpu.assume_multiple %84, 8 : i32
      %86 = arith.index_cast %85 : i32 to index
      %c0_35 = arith.constant 0 : index
      %87 = vector.load %arg13[%86, %c0_35] : memref<24x64xf32, #tpu.memory_space<vmem>>, vector<8x64xf32>
      tpu.vector_store %arg13[%86, %c0_35], %83 {strides = array<i32>} : memref<24x64xf32, #tpu.memory_space<vmem>>, vector<8x64xf32>,
      %88 = vector.broadcast %7 : vector<8x1xf32> to vector<8x64xf32>
      %89 = arith.mulf %83, %88 : vector<8x64xf32>
      %c0_36 = arith.constant 0 : index
      %c0_37 = arith.constant 0 : index
      %90 = vector.load %arg11[%c0_36, %c0_37] : memref<1x64xf32, #tpu.memory_space<vmem>>, vector<1x64xf32>
      %cst_38 = arith.constant dense<0.000000e+00> : vector<64xf32>
      %91 = vector.multi_reduction <add>, %89, %cst_38 [0] : vector<8x64xf32> to vector<64xf32>
      %92 = vector.shape_cast %91 : vector<64xf32> to vector<1x64xf32>
      %93 = arith.addf %90, %92 : vector<1x64xf32>
      %c0_39 = arith.constant 0 : index
      %c0_40 = arith.constant 0 : index
      %94 = vector.load %arg11[%c0_39, %c0_40] : memref<1x64xf32, #tpu.memory_space<vmem>>, vector<1x64xf32>
      tpu.vector_store %arg11[%c0_39, %c0_40], %93 {strides = array<i32>} : memref<1x64xf32, #tpu.memory_space<vmem>>, vector<1x64xf32>,
      %c0_41 = arith.constant 0 : index
      %c0_42 = arith.constant 0 : index
      %95 = vector.load %arg12[%c0_41, %c0_42] : memref<1x64xf32, #tpu.memory_space<vmem>>, vector<1x64xf32>
      %96 = arith.mulf %89, %89 : vector<8x64xf32>
      %cst_43 = arith.constant dense<0.000000e+00> : vector<64xf32>
      %97 = vector.multi_reduction <add>, %96, %cst_43 [0] : vector<8x64xf32> to vector<64xf32>
      %98 = vector.shape_cast %97 : vector<64xf32> to vector<1x64xf32>
      %99 = arith.addf %95, %98 : vector<1x64xf32>
      %c0_44 = arith.constant 0 : index
      %c0_45 = arith.constant 0 : index
      %100 = vector.load %arg12[%c0_44, %c0_45] : memref<1x64xf32, #tpu.memory_space<vmem>>, vector<1x64xf32>
      tpu.vector_store %arg12[%c0_44, %c0_45], %99 {strides = array<i32>} : memref<1x64xf32, #tpu.memory_space<vmem>>, vector<1x64xf32>,
    } else {
    }
    %c2_i32 = arith.constant 2 : i32
    %24 = arith.cmpi eq, %arg0, %c2_i32 : i32
    %25 = arith.extui %24 : i1 to i32
    %c0_i32_8 = arith.constant 0 : i32
    %26 = arith.cmpi ne, %25, %c0_i32_8 : i32
    scf.if %26 {
      %c0 = arith.constant 0 : index
      %c0_9 = arith.constant 0 : index
      %27 = vector.load %arg11[%c0, %c0_9] : memref<1x64xf32, #tpu.memory_space<vmem>>, vector<1x64xf32>
      %cst = arith.constant 5.000000e-02 : f32
      %28 = vector.broadcast %cst : f32 to vector<1x64xf32>
      %29 = arith.mulf %27, %28 : vector<1x64xf32>
      %c0_10 = arith.constant 0 : index
      %c0_11 = arith.constant 0 : index
      %30 = vector.load %arg12[%c0_10, %c0_11] : memref<1x64xf32, #tpu.memory_space<vmem>>, vector<1x64xf32>
      %cst_12 = arith.constant 5.000000e-02 : f32
      %31 = vector.broadcast %cst_12 : f32 to vector<1x64xf32>
      %32 = arith.mulf %30, %31 : vector<1x64xf32>
      %33 = arith.mulf %29, %29 : vector<1x64xf32>
      %34 = arith.subf %32, %33 : vector<1x64xf32>
      %cst_13 = arith.constant 9.99999974E-6 : f32
      %35 = vector.broadcast %cst_13 : f32 to vector<1x64xf32>
      %36 = arith.addf %34, %35 : vector<1x64xf32>
      %37 = math.rsqrt %36 : vector<1x64xf32>
      %c8_i32_14 = arith.constant 8 : i32
      %38 = arith.muli %arg1, %c8_i32_14 : i32
      %39 = tpu.assume_multiple %38, 8 : i32
      %40 = arith.index_cast %39 : i32 to index
      %c0_15 = arith.constant 0 : index
      %41 = vector.load %arg13[%40, %c0_15] : memref<24x64xf32, #tpu.memory_space<vmem>>, vector<8x64xf32>
      %42 = vector.broadcast %29 : vector<1x64xf32> to vector<8x64xf32>
      %43 = arith.subf %41, %42 : vector<8x64xf32>
      %44 = vector.broadcast %37 : vector<1x64xf32> to vector<8x64xf32>
      %45 = arith.mulf %43, %44 : vector<8x64xf32>
      %c0_16 = arith.constant 0 : index
      %c0_17 = arith.constant 0 : index
      %46 = vector.load %arg2[%c0_16, %c0_17] : memref<8x64xf32, #tpu.memory_space<vmem>>, vector<8x64xf32>
      %47 = arith.addf %46, %45 : vector<8x64xf32>
      %cst_18 = arith.constant 0.000000e+00 : f32
      %48 = vector.broadcast %cst_18 : f32 to vector<8x64xf32>
      %49 = arith.maximumf %47, %48 : vector<8x64xf32>
      %50 = vector.broadcast %cst_18 : f32 to vector<8x64xf32>
      %51 = arith.subf %47, %50 : vector<8x64xf32>
      %52 = arith.cmpf one, %51, %51 : vector<8x64xf32>
      %53 = vector.broadcast %cst_18 : f32 to vector<8x64xf32>
      %54 = arith.addf %47, %53 : vector<8x64xf32>
      %55 = math.absf %51 : vector<8x64xf32>
      %cst_19 = arith.constant 0.000000e+00 : f32
      %56 = vector.broadcast %cst_19 : f32 to vector<8x64xf32>
      %57 = arith.subf %56, %55 : vector<8x64xf32>
      %58 = math.exp %57 : vector<8x64xf32>
      %59 = math.log1p %58 : vector<8x64xf32>
      %60 = arith.addf %49, %59 : vector<8x64xf32>
      %61 = arith.select %52, %54, %60 : vector<8x64xi1>, vector<8x64xf32>
      %62 = arith.addf %61, %46 : vector<8x64xf32>
      %cst_20 = arith.constant 0.000000e+00 : f32
      %63 = vector.broadcast %cst_20 : f32 to vector<8x64xf32>
      %64 = arith.maximumf %62, %63 : vector<8x64xf32>
      %65 = vector.broadcast %cst_20 : f32 to vector<8x64xf32>
      %66 = arith.subf %62, %65 : vector<8x64xf32>
      %67 = arith.cmpf one, %66, %66 : vector<8x64xf32>
      %68 = vector.broadcast %cst_20 : f32 to vector<8x64xf32>
      %69 = arith.addf %62, %68 : vector<8x64xf32>
      %70 = math.absf %66 : vector<8x64xf32>
      %cst_21 = arith.constant 0.000000e+00 : f32
      %71 = vector.broadcast %cst_21 : f32 to vector<8x64xf32>
      %72 = arith.subf %71, %70 : vector<8x64xf32>
      %73 = math.exp %72 : vector<8x64xf32>
      %74 = math.log1p %73 : vector<8x64xf32>
      %75 = arith.addf %64, %74 : vector<8x64xf32>
      %76 = arith.select %67, %69, %75 : vector<8x64xi1>, vector<8x64xf32>
      %c0_22 = arith.constant 0 : index
      %c0_23 = arith.constant 0 : index
      %77 = vector.load %arg8[%c0_22, %c0_23] : memref<8x64xf32, #tpu.memory_space<vmem>>, vector<8x64xf32>
      tpu.vector_store %arg8[%c0_22, %c0_23], %76 {strides = array<i32>} : memref<8x64xf32, #tpu.memory_space<vmem>>, vector<8x64xf32>,
    } else {
    }
    return
  }
  func.func @transform_0(%arg0: i32, %arg1: i32) -> (i32, i32) {
    %c0_i32 = arith.constant 0 : i32
    %c0_i32_0 = arith.constant 0 : i32
    return %arg1, %c0_i32 : i32, i32
  }
  func.func @transform_1(%arg0: i32, %arg1: i32) -> (i32, i32, i32) {
    %c2_i32 = arith.constant 2 : i32
    %0 = arith.cmpi slt, %arg0, %c2_i32 : i32
    %c0_i32 = arith.constant 0 : i32
    %1 = arith.select %0, %arg1, %c0_i32 : i32
    %c0_i32_0 = arith.constant 0 : i32
    %c0_i32_1 = arith.constant 0 : i32
    %c0_i32_2 = arith.constant 0 : i32
    return %1, %c0_i32_0, %c0_i32_1 : i32, i32, i32
  }
  func.func @transform_2(%arg0: i32, %arg1: i32) -> (i32, i32, i32) {
    %c2_i32 = arith.constant 2 : i32
    %0 = arith.cmpi slt, %arg0, %c2_i32 : i32
    %c0_i32 = arith.constant 0 : i32
    %1 = arith.select %0, %arg1, %c0_i32 : i32
    %c0_i32_0 = arith.constant 0 : i32
    %c0_i32_1 = arith.constant 0 : i32
    %c0_i32_2 = arith.constant 0 : i32
    return %1, %c0_i32_0, %c0_i32_1 : i32, i32, i32
  }
  func.func @transform_3(%arg0: i32, %arg1: i32) -> (i32, i32) {
    %c0_i32 = arith.constant 0 : i32
    %c0_i32_0 = arith.constant 0 : i32
    %c0_i32_1 = arith.constant 0 : i32
    return %c0_i32, %c0_i32_0 : i32, i32
  }
  func.func @transform_4(%arg0: i32, %arg1: i32) -> (i32, i32) {
    %c0_i32 = arith.constant 0 : i32
    %c0_i32_0 = arith.constant 0 : i32
    %c0_i32_1 = arith.constant 0 : i32
    return %c0_i32, %c0_i32_0 : i32, i32
  }
  func.func @transform_5(%arg0: i32, %arg1: i32) -> (i32, i32) {
    %c0_i32 = arith.constant 0 : i32
    %c0_i32_0 = arith.constant 0 : i32
    %c0_i32_1 = arith.constant 0 : i32
    return %c0_i32, %c0_i32_0 : i32, i32
  }
  func.func @transform_6(%arg0: i32, %arg1: i32) -> (i32, i32) {
    %c2_i32 = arith.constant 2 : i32
    %0 = arith.cmpi eq, %arg0, %c2_i32 : i32
    %c0_i32 = arith.constant 0 : i32
    %1 = arith.select %0, %arg1, %c0_i32 : i32
    %c0_i32_0 = arith.constant 0 : i32
    %c0_i32_1 = arith.constant 0 : i32
    return %1, %c0_i32_0 : i32, i32
  }
}

</mosaic_0001>

<bundles_post_ra>
// kernel: tpu_custom_call.1
= control target key start
LH: loop header
LB: loop body
LE: loop exit
PB: predicated region body
PF: predicated region fallthrough
CT: control target
= control target key end

     0   :  { %s3501_s0 = inlined_call_operand.hbm [shape: f32[24,64], index: 0, kind: input, shape index: {}]   ;;  %s3502_s1 = inlined_call_operand.hbm [shape: f32[24,4,128], index: 1, kind: input, shape index: {}]   ;;  %s3503_s2 = inlined_call_operand.hbm [shape: f32[24,4,32], index: 2, kind: input, shape index: {}]   ;;  %s3504_s3 = inlined_call_operand.hbm [shape: f32[64,128], index: 3, kind: input, shape index: {}]   ;;  %s3505_s4 = inlined_call_operand.hbm [shape: f32[32,128], index: 4, kind: input, shape index: {}]   ;;  %s3506_s5 = inlined_call_operand.vmem [shape: f32[1,128], index: 5, kind: input, shape index: {}]   ;;  %s3507_s6 = inlined_call_operand.hbm [shape: f32[24,64], index: 6, kind: output, shape index: {}]  }
   0x1   :  { %3538 = sst [smem:[#allocation36_spill]] %s3501_s0 }
   0x2   :  { %3539 = sst [smem:[#allocation37_spill]] %s3502_s1 }
   0x3   :  { %3540 = sst [smem:[#allocation38_spill]] %s3504_s3 }
   0x4   :  { %3541 = sst [smem:[#allocation39_spill]] %s3506_s5 }
   0x5   :  { %3542 = sst [smem:[#allocation40_spill]] %s3507_s6 }
   0x6   :  { %11 = vsyncpa [#allocation8], 0 }
   0x7   :  { %13 = vsyncpa [#allocation8 + $0x1], 0 }
   0x8   :  { %14 = vsyncpa [#allocation11], 0 }
   0x9   :  { %16 = vsyncpa [#allocation11 + $0x1], 0 }
   0xa   :  { %17 = vsyncpa [#allocation14], 0 }
   0xb   :  { %18 = vsyncpa [#allocation9], 0 }
   0xc   :  { %20 = vsyncpa [#allocation9 + $0x1], 0  ;;  %s2725_s21 = smov 0   ;;  %s2727_s22 = smov 0  }
   0xd   :  { %s2729_s23 = smov 0   ;;  %s2731_s24 = smov 0  }
   0xe   :  { %s2733_s25 = smov 0   ;;  %s2735_s26 = smov 0  }
   0xf   :  { %s2737_s27 = smov 0   ;;  %s2739_s28 = smov 0  }
  0x10   :  { %s2741_s29 = smov 0   ;;  %s2743_s30 = smov 0  }
  0x11   :  { %s2745_s7 = smov 0   ;;  %s2747_s8 = smov 0  }
  0x12   :  { %s2749_s9 = smov 0   ;;  %s2751_s10 = smov 0  }
  0x13 LB: > { %3543 = sst [smem:[#allocation21_spill]] %s2614_s21  ;;  %s2794_s11 = sadd.s32 4294967295, %s2666_s10   ;;  %s2666_s10 = sphi %s2751_s10, %s26_s10   ;;  %s2662_s9 = sphi %s2749_s9, %s3635_s9   ;;  %s2658_s8 = sphi %s2747_s8, %s3634_s8   ;;  %s2654_s7 = sphi %s2745_s7, %s3628_s7   ;;  %s2650_s30 = sphi %s2743_s30, %s3633_s30   ;;  %s2646_s29 = sphi %s2741_s29, %s3632_s29   ;;  %s2642_s28 = sphi %s2739_s28, %s3631_s28   ;;  %s2638_s27 = sphi %s2737_s27, %s3630_s27   ;;  %s2634_s26 = sphi %s2735_s26, %s3627_s26   ;;  %s2630_s25 = sphi %s2733_s25, %s3626_s25   ;;  %s2626_s24 = sphi %s2731_s24, %s3625_s24   ;;  %s2622_s23 = sphi %s2729_s23, %s3624_s23   ;;  %s2618_s22 = sphi %s2727_s22, %s3623_s22   ;;  %s2614_s21 = sphi %s2725_s21, %s3622_s21  }
  0x14   : > { %3544 = sst [smem:[#allocation22_spill]] %s2618_s22  ;;  %s1918_s12 = sadd.s32 4294967294, %s2666_s10  }
  0x15   : > { %3545 = sst [smem:[#allocation23_spill]] %s2622_s23  ;;  %p3511_p0 = scmp.eq.s32.totalorder %s2794_s11, 0 }
  0x16   : > { %3546 = sst [smem:[#allocation24_spill]] %s2630_s25  ;;  %p88_p1 = scmp.ne.s32.totalorder %s2630_s25, %s2626_s24 }
  0x17   : > { %3547 = sst [smem:[#allocation25_spill]] %s2634_s26  ;;  %p208_p2 = scmp.ne.s32.totalorder %s2622_s23, %s2618_s22 }
  0x18   : > { %3548 = sst [smem:[#allocation26_spill]] %s2650_s30  ;;  %p2804_p3 = por %p88_p1, %p3511_p0 }
  0x19   : > { %3549 = sst [smem:[#allocation27_spill]] %s2654_s7  ;;  %p209_p4 = scmp.eq.s32.totalorder %s2794_s11, 8 }
  0x1a   : > { %3550 = sst [smem:[#allocation28_spill]] %s2662_s9  ;;  %p214_p5 = scmp.ne.s32.totalorder %s2618_s22, %s2614_s21 }
  0x1b   : > { %s3551_s14 = scalar_select %p2804_p3, 1, 0 }
  0x1c   : > { %p215_p6 = scmp.eq.s32.totalorder %s1918_s12, 8  ;;  %p2811_p7 = por %p209_p4, %p208_p2 }
  0x1d   : > { %3552 = sst [smem:[#allocation29_spill]] %s3551_s14  ;;  %p1919_p8 = scmp.ge.s32.totalorder %s2666_s10, 1 }
  0x1e   : > { %s3553_s15 = scalar_select %p2811_p7, 1, 0 }
  0x1f   : > { %p2816_p9 = por %p215_p6, %p214_p5  ;;  %p222_p10 = scmp.lt.s32.totalorder %s2666_s10, 10 }
  0x20   : > { %3554 = sst [smem:[#allocation30_spill]] %s3553_s15  ;;  %s2668_s18 = smov [#allocation13]  }
  0x21   : > { %s3555_s16 = scalar_select %p2816_p9, 1, 0 }
  0x22   : > { %p2821_p11 = pnand %p1919_p8, %p222_p10  ;;  %s234_s19 = sshll.u32 %s2668_s18, 4  ;;  %s235_s19 = int_to_ptr.vmem [resolvable:$true] %s234_s19 }
  0x23   : > { %3556 = sst [smem:[#allocation31_spill]] %s3555_s16 }
  0x24   : > { %s3557_s17 = scalar_select %p2821_p11, 1, 0 }
  0x25   : > { %p2125_p12 = pneg %p2821_p11  ;;  %s3560_s3 = sld [smem:[#allocation38_spill]] }
  0x26   : > { %3558 = sst [smem:[#allocation32_spill]] %s3557_s17 }
  0x27   : > { %p2829_p13 = pnand %p2125_p12, %p3511_p0 }
  0x29   : > { %p3531_p2 = pneg %p2829_p13 }
  0x2b   : > { %s2366_s13 = scalar_lea.hbm %s3560_s3, 1024 }
  0x2c   : > { %p2367_p1 = scmp.ne.s32.totalorder %s3560_s3, %s2366_s13  ;;  %p2373_p6 = scmp.lt.u32.totalorder %s2366_s13, %s3560_s3 }
  0x2e   : > { %p2369_p4 = pnand %p3531_p2, %p2367_p1 }
  0x30   : > { %p2370_p5 = pneg %p2369_p4 }
  0x32   : > { %p2375_p8 = pnand %p2373_p6, %p2370_p5 }
  0x34   : > { %2378 = shalt.err (!%p2375_p8)
}
  0x35   : > { %s2379_s24 = scalar_lea.vmem %s235_s19, 1024  ;;  %p2387_p9 = scmp.lt.s32.totalorder %s235_s19, %s235_s19 }
  0x36   : > { %p2380_p10 = scmp.ne.s32.totalorder %s235_s19, %s2379_s24  ;;  %p2388_p7 = scmp.lt.s32.totalorder %s2379_s24, %s2379_s24 }
  0x38   : > { %p2382_p12 = pnand %p2380_p10, %p3531_p2  ;;  %p2389_p3 = por %p2388_p7, %p2387_p9 }
  0x3a   : > { %p2383_p0 = pneg %p2382_p12 }
  0x3c   : > { %p2390_p11 = pnand %p2389_p3, %p2383_p0 }
  0x3e   : > { %2393 = shalt.err (!%p2390_p11)
}
  0x3f   : > { %s3517_s21 = smov 128   ;;  %s3518_s6 = smov 8  }
  0x40   : > { %2128 = dma.hbm_to_vmem [thread:$0]  (!%p2829_p13), %s3560_s3, 1024, %s235_s19, [#allocation14], %s3517_s21, %s3517_s21, %s3518_s6  }
  0x41   : > { %s35_s12 = sadd.s32 1, %s2658_s8  ;;  %s38_s18 = sadd.s32 1, %s2662_s9 }
  0x42   : > { %p36_p0 = scmp.ge.s32.totalorder %s35_s12, 3  ;;  %p3530_p3 = scmp.eq.s32.totalorder %s2666_s10, 0 }
  0x43   : > { %p68_p7 = scmp.lt.s32.totalorder %s2662_s9, 2  ;;  %s75_s15 = sadd.s32 1, %s2634_s26 }
  0x44   : > { %s3637_s12 = smov (%p36_p0, %s35_s12), 0  ;;  %s3639_s18 = smov (!%p36_p0, %s38_s18), %s2662_s9 }
  0x45   : > { %s2866_s24 = scalar_select %p68_p7, %s2658_s8, 0 }
  0x46   : > { %p40_p9 = scmp.ge.s32.totalorder %s3639_s18, 3  ;;  %p82_p11 = scmp.ne.s32.totalorder %s2634_s26, %s2630_s25 }
  0x47   : > { %p191_p1 = scmp.eq.s32.totalorder %s2662_s9, 2  ;;  %p3529_p5 = scmp.lt.s32.totalorder %s2666_s10, 9 }
  0x48   : > { %s3641_s18 = smov (%p40_p9, %s3639_s18), 0  ;;  %p2876_p4 = por %p82_p11, %p3530_p3 }
  0x49   : > { %3561 = sst [smem:[#allocation33_spill]] %s3641_s18  ;;  %p70_p6 = scmp.lt.s32.totalorder %s3641_s18, 2 }
  0x4a   : > { %p193_p8 = scmp.eq.s32.totalorder %s3641_s18, 2  ;;  %s282_s3 = sand.u32 1, %s2666_s10  }
  0x4b   : > { %s192_s13 = scalar_select %p191_p1, %s2658_s8, 0 }
  0x4c   : > { %s71_s16 = scalar_select %p70_p6, %s3637_s12, 0 }
  0x4d   : > { %s194_s21 = scalar_select %p193_p8, %s3637_s12, 0 }
  0x4e   : > { %s72_s6 = ssub.s32 %s2866_s24, %s71_s16  ;;  %s3564_s7 = sadd.s32 1, %s2622_s23 }
  0x4f   : > { %p73_p10 = scmp.eq.s32.totalorder %s72_s6, 0  ;;  %s195_s9 = ssub.s32 %s192_s13, %s194_s21 }
  0x50   : > { %p196_p12 = scmp.eq.s32.totalorder %s195_s9, 0  ;;  %s284_s22 = sand.u32 1, %s2634_s26  }
  0x51   : > { %s2889_s5 = scalar_select %p73_p10, %s2634_s26, %s75_s15  }
  0x52   : > { %s2894_s30 = scalar_select %p196_p12, %s2622_s23, %s3564_s7  }
  0x53   : > { %3563 = sst [smem:[#allocation34_spill]] %s2889_s5  ;;  %s1967_s14 = sshll.u32 %s2866_s24, 9 }
  0x54   : > { %3565 = sst [smem:[#allocation35_spill]] %s2894_s30  ;;  %s2898_s25 = sshll.u32 %s284_s22, 5 }
  0x55   : > { %s3566_s1 = sld [smem:[#allocation37_spill]]  ;;  %p2911_p0 = pnand %p3529_p5, %p2876_p4 }
  0x56   : > { %s286_s22 = scalar_lea.vmem [#allocation10], %s2898_s25  ;;  %s2918_s15 = scalar_lea.sflag [#allocation11], %s282_s3 }
  0x57   : > { %s3567_s7 = scalar_select %p2911_p0, 1, 0 }
  0x58   : > { %s295_s9 = sshll.u32 %s286_s22, 4  ;;  %p3534_p9 = pneg %p2911_p0  ;;  %s2916_s9 = int_to_ptr.vmem [resolvable:$true] %s295_s9 }
  0x5b   : > { %s2905_s0 = scalar_lea.hbm %s3566_s1, %s1967_s14  ;;  %s2399_s18 = scalar_lea.hbm %s3566_s1, 1536 }
  0x5c   : > { %s2394_s17 = scalar_lea.hbm %s2905_s0, 512  ;;  %p2400_p4 = scmp.lt.u32.totalorder %s2905_s0, %s3566_s1 }
  0x5d   : > { %p2395_p7 = scmp.ne.s32.totalorder %s2905_s0, %s2394_s17  ;;  %p2401_p6 = scmp.lt.u32.totalorder %s2399_s18, %s2394_s17 }
  0x5e   : > { %p2403_p10 = scmp.lt.u32.totalorder %s2394_s17, %s2905_s0 }
  0x5f   : > { %p2397_p11 = pnand %p3534_p9, %p2395_p7  ;;  %p2402_p8 = por %p2401_p6, %p2400_p4 }
  0x61   : > { %p2398_p1 = pneg %p2397_p11  ;;  %p2404_p12 = por %p2403_p10, %p2402_p8 }
  0x63   : > { %p2405_p5 = pnand %p2404_p12, %p2398_p1 }
  0x65   : > { %2408 = shalt.err (!%p2405_p5)
}
  0x66   : > { %s2409_s3 = scalar_lea.vmem %s2916_s9, 512  ;;  %s2671_s16 = smov [#allocation10]  }
  0x67   : > { %p2410_p7 = scmp.ne.s32.totalorder %s2916_s9, %s2409_s3  ;;  %s2414_s22 = sshll.u32 %s2671_s16, 4  ;;  %s2415_s22 = int_to_ptr.vmem [resolvable:$false] %s2414_s22 }
  0x68   : > { %s2416_s21 = scalar_lea.vmem %s2415_s22, 1024  ;;  %p2417_p2 = scmp.lt.s32.totalorder %s2916_s9, %s2415_s22 }
  0x69   : > { %p2412_p11 = pnand %p2410_p7, %p3534_p9  ;;  %p2418_p4 = scmp.lt.s32.totalorder %s2416_s21, %s2409_s3 }
  0x6b   : > { %p2413_p3 = pneg %p2412_p11  ;;  %p2419_p6 = por %p2418_p4, %p2417_p2 }
  0x6d   : > { %p2420_p8 = pnand %p2419_p6, %p2413_p3 }
  0x6f   : > { %2423 = shalt.err (!%p2420_p8)
}
  0x70   : > { %s2672_s17 = smov 64   ;;  %s2673_s6 = smov 4  }
  0x71   : > { %2138 = dma.hbm_to_vmem [thread:$0]  (!%p2911_p0), %s2905_s0, 512, %s2916_s9, %s2918_s15, %s2672_s17, %s2672_s17, %s2673_s6  }
  0x72   : > { %s2954_s13 = scalar_lea.hbm %s3503_s2, %s1967_s14  ;;  %s309_s3 = scalar_lea.vmem [#allocation12], %s2898_s25 }
  0x73   : > { %s318_s16 = sshll.u32 %s309_s3, 4  ;;  %s2674_s22 = smov [#allocation15]   ;;  %s2957_s16 = int_to_ptr.vmem [resolvable:$true] %s318_s16 }
  0x74   : > { %s247_s21 = sshll.u32 %s2674_s22, 4  ;;  %s2424_s26 = scalar_lea.hbm %s3505_s4, 512  ;;  %s248_s21 = int_to_ptr.vmem [resolvable:$true] %s247_s21 }
  0x75   : > { %p2425_p2 = scmp.ne.s32.totalorder %s3505_s4, %s2424_s26  ;;  %p3568_p3 = pneg %p2829_p13 }
  0x76   : > { %p2431_p10 = scmp.lt.u32.totalorder %s2424_s26, %s3505_s4 }
  0x77   : > { %p2427_p5 = pnand %p2425_p2, %p3568_p3 }
  0x79   : > { %p2428_p1 = pneg %p2427_p5 }
  0x7b   : > { %p2433_p12 = pnand %p2431_p10, %p2428_p1 }
  0x7d   : > { %2436 = shalt.err (!%p2433_p12)
}
  0x7e   : > { %s2437_s14 = scalar_lea.vmem %s248_s21, 512  ;;  %p3569_p11 = pmov %p3568_p3 }
  0x7f   : > { %p2438_p7 = scmp.ne.s32.totalorder %s248_s21, %s2437_s14  ;;  %p2445_p8 = scmp.lt.s32.totalorder %s248_s21, %s248_s21 }
  0x80   : > { %p2446_p9 = scmp.lt.s32.totalorder %s2437_s14, %s2437_s14 }
  0x81   : > { %p2440_p4 = pnand %p2438_p7, %p3569_p11 }
  0x82   : > { %p2447_p0 = por %p2446_p9, %p2445_p8 }
  0x83   : > { %p2441_p6 = pneg %p2440_p4 }
  0x85   : > { %p2448_p2 = pnand %p2447_p0, %p2441_p6 }
  0x87   : > { %2451 = shalt.err (!%p2448_p2)
}
  0x88   : > { %s3570_s1 = smov 8   ;;  %s3571_s5 = smov 128  }
  0x89   : > { %2131 = dma.hbm_to_vmem [thread:$0]  (!%p2829_p13), %s3505_s4, 512, %s248_s21, [#allocation14], %s3571_s5, %s3571_s5, %s3570_s1  }
  0x8a   : > { %s42_s30 = ssub.s32 %s2658_s8, %s3637_s12  ;;  %s45_s20 = sadd.s32 1, %s2646_s29 }
  0x8b   : > { %p43_p0 = scmp.eq.s32.totalorder %s42_s30, 0  ;;  %p52_p9 = scmp.ne.s32.totalorder %s2646_s29, %s2642_s28 }
  0x8c   : > { %p58_p3 = scmp.ne.s32.totalorder %s2642_s28, %s2638_s27  ;;  %s264_s24 = sand.u32 1, %s2646_s29  }
  0x8d   : > { %s2991_s9 = scalar_select %p43_p0, %s2646_s29, %s45_s20  }
  0x8e   : > { %p3572_p5 = scmp.eq.s32.totalorder %s2666_s10, 0  ;;  %p3573_p10 = scmp.eq.s32.totalorder %s2794_s11, 0 }
  0x8f   : > { %s1923_s19 = sshll.u32 %s264_s24, 3  ;;  %s1924_s3 = sshll.u32 %s2658_s8, 7 }
  0x90   : > { %p54_p1 = por %p3572_p5, %p52_p9  ;;  %p2997_p12 = por %p3573_p10, %p58_p3 }
  0x91   : > { %s3575_s0 = sld [smem:[#allocation36_spill]]  ;;  %s268_s27 = scalar_lea.vmem [#allocation7], %s1923_s19 }
  0x92   : > { %s3574_s18 = scalar_select %p2997_p12, 1, 0 }
  0x93   : > { %s275_s14 = sshll.u32 %s268_s27, 4  ;;  %p3576_p13 = scmp.lt.s32.totalorder %s2666_s10, 9  ;;  %s3009_s14 = int_to_ptr.vmem [resolvable:$true] %s275_s14 }
  0x94   : > { %s2452_s5 = scalar_lea.hbm %s2954_s13, 512  ;;  %p3578_p4 = scmp.ne.s32.totalorder %s3567_s7, 0 }
  0x95   : > { %p3013_p7 = pnand %p3576_p13, %p54_p1  ;;  %p2453_p11 = scmp.ne.s32.totalorder %s2954_s13, %s2452_s5 }
  0x96   : > { %p3579_p6 = pneg %p3578_p4  ;;  %s2457_s30 = scalar_lea.hbm %s3503_s2, 1536 }
  0x97   : > { %s3007_s25 = scalar_lea.hbm %s3575_s0, %s1924_s3  ;;  %p2458_p0 = scmp.lt.u32.totalorder %s2954_s13, %s3503_s2 }
  0x98   : > { %p2455_p8 = pnand %p2453_p11, %p3579_p6  ;;  %p2459_p9 = scmp.lt.u32.totalorder %s2457_s30, %s2452_s5 }
  0x99   : > { %p2461_p5 = scmp.lt.u32.totalorder %s2452_s5, %s2954_s13 }
  0x9a   : > { %p2456_p2 = pneg %p2455_p8  ;;  %p2460_p3 = por %p2459_p9, %p2458_p0 }
  0x9c   : > { %p2462_p1 = por %p2461_p5, %p2460_p3 }
  0x9e   : > { %p2463_p10 = pnand %p2462_p1, %p2456_p2 }
  0xa0   : > { %2466 = shalt.err (!%p2463_p10)
}
  0xa1   : > { %s2467_s3 = scalar_lea.vmem %s2957_s16, 512  ;;  %p3580_p11 = pmov %p3579_p6 }
  0xa2   : > { %p2468_p13 = scmp.ne.s32.totalorder %s2957_s16, %s2467_s3  ;;  %s2675_s22 = smov [#allocation12]  }
  0xa3   : > { %s2472_s21 = sshll.u32 %s2675_s22, 4  ;;  %s2473_s21 = int_to_ptr.vmem [resolvable:$false] %s2472_s21 }
  0xa4   : > { %p2470_p6 = pnand %p2468_p13, %p3580_p11  ;;  %s2474_s27 = scalar_lea.vmem %s2473_s21, 1024 }
  0xa5   : > { %p2475_p12 = scmp.lt.s32.totalorder %s2957_s16, %s2473_s21  ;;  %p2476_p0 = scmp.lt.s32.totalorder %s2474_s27, %s2467_s3 }
  0xa6   : > { %p2471_p8 = pneg %p2470_p6 }
  0xa7   : > { %p2477_p9 = por %p2476_p0, %p2475_p12 }
  0xa9   : > { %p2478_p3 = pnand %p2477_p9, %p2471_p8 }
  0xab   : > { %2481 = shalt.err (!%p2478_p3)
}
  0xac   : > { %2141 = dma.hbm_to_vmem [thread:$0]  (!%p3578_p4), %s2954_s13, 512, %s2957_s16, %s2918_s15, %s2672_s17, %s2672_s17, %s2673_s6  }
  0xad   : > { %s265_s5 = scalar_lea.sflag [#allocation8], %s264_s24  ;;  %s2482_s23 = scalar_lea.hbm %s3007_s25, 128 }
  0xae   : > { %p2483_p12 = scmp.ne.s32.totalorder %s3007_s25, %s2482_s23  ;;  %p2484_p2 = pneg %p3013_p7 }
  0xaf   : > { %s2487_s30 = scalar_lea.hbm %s3575_s0, 384  ;;  %p2488_p10 = scmp.lt.u32.totalorder %s3007_s25, %s3575_s0 }
  0xb0   : > { %p2485_p5 = pnand %p2484_p2, %p2483_p12  ;;  %p2489_p13 = scmp.lt.u32.totalorder %s2487_s30, %s2482_s23 }
  0xb1   : > { %p2491_p11 = scmp.lt.u32.totalorder %s2482_s23, %s3007_s25 }
  0xb2   : > { %p2486_p1 = pneg %p2485_p5  ;;  %p2490_p4 = por %p2489_p13, %p2488_p10 }
  0xb4   : > { %p2492_p6 = por %p2491_p11, %p2490_p4 }
  0xb6   : > { %p2493_p8 = pnand %p2492_p6, %p2486_p1 }
  0xb8   : > { %2496 = shalt.err (!%p2493_p8)
}
  0xb9   : > { %s2497_s15 = scalar_lea.vmem %s3009_s14, 128  ;;  %s2676_s17 = smov [#allocation7]  }
  0xba   : > { %p2498_p0 = scmp.ne.s32.totalorder %s3009_s14, %s2497_s15  ;;  %s2502_s6 = sshll.u32 %s2676_s17, 4  ;;  %s2503_s6 = int_to_ptr.vmem [resolvable:$false] %s2502_s6 }
  0xbb   : > { %s2504_s13 = scalar_lea.vmem %s2503_s6, 256  ;;  %p2505_p12 = scmp.lt.s32.totalorder %s3009_s14, %s2503_s6 }
  0xbc   : > { %p2500_p9 = pnand %p2498_p0, %p2484_p2  ;;  %p2506_p5 = scmp.lt.s32.totalorder %s2504_s13, %s2497_s15 }
  0xbe   : > { %p2501_p3 = pneg %p2500_p9  ;;  %p2507_p10 = por %p2506_p5, %p2505_p12 }
  0xc0   : > { %p2508_p13 = pnand %p2507_p10, %p2501_p3 }
  0xc2   : > { %2511 = shalt.err (!%p2508_p13)
}
  0xc3   : > { %2135 = dma.hbm_to_vmem [thread:$0]  (!%p3013_p7), %s3007_s25, 128, %s3009_s14, %s265_s5  }
  0xc4   : > { %s3581_s16 = sld [smem:[#allocation32_spill]] }
  0xca   : > { %p3582_p1 = scmp.ne.s32.totalorder %s3581_s16, 0 }
  0xcb   : > { %s332_s24 = sand.u32 (!%p3582_p1), 1, %s2642_s28   ;;  %p3583_p2 = scmp.ne.s32.totalorder (!%p3582_p1), %s3574_s18, 0 }
  0xcc   : > { %330 = sbr.rel (%p3582_p1) target bundleno = 1141 (0x475), region = 44  ;;  %s1932_s3 = sshll.u32 (!%p3582_p1), %s332_s24, 3 }
  0xcd   : > { %s333_s22 = scalar_lea.sflag (!%p3582_p1), [#allocation8], %s332_s24  ;;  %s3074_s21 = scalar_lea.vmem (!%p3582_p1), [#allocation7], %s1932_s3 }
  0xd3   : > { %2597 = dma.done.wait (%p3583_p2), %s333_s22, 128  }
  0xd4   : > { %2599 = vsyncadd (%p3583_p2), %s333_s22, 4294967168  ;;  %s3584_s1 = sld [smem:[#allocation24_spill]]  ;;  %s3585_s27 = sld [smem:[#allocation29_spill]] }
  0xd5   : > { %s341_s23 = sand.u32 1, %s2794_s11  }
  0xd6   : > { %s342_s5 = scalar_lea.sflag [#allocation11], %s341_s23 }
  0xda   : > { %s343_s25 = sand.u32 1, %s3584_s1   ;;  %p3586_p7 = scmp.ne.s32.totalorder %s3585_s27, 0 }
  0xdb   : > { %s1933_s14 = sshll.u32 %s343_s25, 5 }
  0xdc   : > { %s3082_s7 = scalar_lea.vmem [#allocation10], %s1933_s14 }
  0xdd   : > { %2601 = dma.done.wait (%p3586_p7), %s342_s5, 1024  }
  0xde   : > { %2603 = vsyncadd (%p3586_p7), %s342_s5, 4294966272  ;;  %s3088_s26 = scalar_lea.vmem [#allocation12], %s1933_s14  ;;  %p3587_p4 = scmp.eq.s32.totalorder %s2794_s11, 0 }
  0xe0   : > { %2605 = dma.done.wait (%p3587_p4), [#allocation14], 1536   ;;  %p3588_p11 = pmov %p3587_p4 }
  0xe1   : > { %s3589_s18 = sld [smem:[#allocation22_spill]]  ;;  %s3590_s30 = sld [smem:[#allocation26_spill]]  ;;  %v410_v0 = vlaneseq  ;;  %v2677_v4 = vmov 0.0  }
  0xe2   : > { %2607 = vsyncadd (%p3588_p11), [#allocation14], 4294965760  ;;  %s3591_s20 = sld [smem:[#allocation27_spill]] }
  0xe3   : > { %v3104_v2 = vshrl.u32 %v410_v0, 7 }
  0xe7   : > { %s398_s19 = sand.u32 1, %s3589_s18   ;;  %s3096_s15 = sshll.u32 %s3590_s30, 3 }
  0xe8   : > { %s3100_s17 = sshll.u32 %s398_s19, 3  ;;  %v412_v1 = vstv %s3096_s15  ;;  %p417_p6 = scmp.eq.s32.totalorder %s3591_s20, 0 }
  0xe9   : > { %p418_p8 = scmp.eq.s32.totalorder %s3590_s30, 0  ;;  %v413_v3 = vadd.s32 %v412_v1, %v3104_v2  ;;  %s400_s11 = scalar_lea.vmem [#allocation16], %s3100_s17 }
  0xeb   : > { %p419_p0 = pnand %p418_p8, %p417_p6  ;;  %vm414_vm0 = vcmp.lt.s32.totalorder %v413_v3, 20 }
  0xec   : > { %v3110_v5 = vsel %vm414_vm0, 1.0, %v2677_v4  ;;  %v2678_v6 = vmov (!%p419_p0), 0.0  }
  0xed   : > { %422 = sbr.rel (%p419_p0) target bundleno = 244 (0xf4), region = 68  ;;  %423 = vst [vmem:[#allocation2] sm:$0x1] (!%p419_p0), %v2678_v6  ;;  %424 = vst [vmem:[#allocation3] sm:$0x1] (!%p419_p0), %v2678_v6 }
  0xf4 PF: > { %s3592_s6 = sld [smem:[#allocation27_spill]] }
  0xfa   : > { %p1940_p9 = scmp.ne.s32.totalorder %s3592_s6, 0 }
  0xfb   : > { %v429_v7 = vld [vmem:[#allocation13] sm:$0xff] (!%p1940_p9)  ;;  %v430_v8 = vld [vmem:[#allocation13 + $0x8] sm:$0xff] (!%p1940_p9)  ;;  %v431_v9 = vld [vmem:[#allocation13 + $0x10] sm:$0xff] (!%p1940_p9)  ;;  %v2679_v10 = vmov (!%p1940_p9), 0.0|0.0   ;;  %vm2680_vm1 = vmmov (!%p1940_p9), 0   ;;  %v2681_v13 = vmov (!%p1940_p9), 0.0  }
  0xfc   : > { %427 = sbr.rel (%p1940_p9) target bundleno = 524 (0x20c), region = 72  ;;  %2069 = vmatprep.subr.bf16.mxu0 (!%p1940_p9), %v2679_v10  ;;  %v2070_v11 = vpack.c.bf16 (!%p1940_p9), %v430_v8, %v429_v7  ;;  %v432_v12 = vld [vmem:[#allocation13 + $0x18] sm:$0xff] (!%p1940_p9)  ;;  %2019 = vmatprep.mubr.msk.f32.mxu0 (!%p1940_p9), %vm2680_vm1, %v2681_v13  ;;  %v433_v14 = vld [vmem:[#allocation13 + $0x20] sm:$0xff] (!%p1940_p9)  ;;  %v434_v17 = vld [vmem:[#allocation13 + $0x28] sm:$0xff] (!%p1940_p9)  ;;  %vm535_vm2 = vcmask (!%p1940_p9), 261120   ;;  %vm437_vm3 = vcmask (!%p1940_p9), 523264  }
  0xfd   : > { %v519_v15 = vld [vmem:[#allocation15] sm:$0xff] (!%p1940_p9)  ;;  %v2073_v16 = vpack.c.bf16 (!%p1940_p9), %v432_v12, %v431_v9  ;;  %v520_v18 = vld [vmem:[#allocation15 + $0x8] sm:$0xff] (!%p1940_p9)  ;;  %v521_v19 = vld [vmem:[#allocation15 + $0x10] sm:$0xff] (!%p1940_p9)  ;;  %v2076_v24 = vpack.c.bf16 (!%p1940_p9), %v434_v17, %v433_v14  ;;  %v2682_v32 = vmov (!%p1940_p9), 1966171168   ;;  %v781_v38 = vsub.s32 (!%p1940_p9), 2, %v3104_v2 }
  0xfe   : > { %2071 = vmatpush3.bf16.msra.mxu0 (!%p1940_p9), %v2070_v11  ;;  %v2081_v20 = vpack.c.bf16 (!%p1940_p9), %v520_v18, %v519_v15  ;;  %v522_v21 = vld [vmem:[#allocation15 + $0x18] sm:$0xff] (!%p1940_p9)  ;;  %v2282_v23 = vld [vmem:[%s3088_s26] sm:$0xff] (!%p1940_p9)   ;;  %v435_v25 = vld [vmem:[#allocation13 + $0x30] sm:$0xff] (!%p1940_p9)  ;;  %v632_v33 = vunpack.c.l.s4 (!%p1940_p9), %v2682_v32  ;;  %v777_v39 = vsub.s32 (!%p1940_p9), 1, %v3104_v2  ;;  %v789_v40 = vsub.s32 (!%p1940_p9), 4, %v3104_v2  ;;  %s3593_s24 = sld [smem:[#allocation39_spill]] (!%p1940_p9) }
  0xff   : > { %2072 = vmatprep.subr.bf16.mxu0 (!%p1940_p9), %v2679_v10  ;;  %v2085_v22 = vpack.c.bf16 (!%p1940_p9), %v522_v21, %v521_v19  ;;  %v436_v26 = vld [vmem:[#allocation13 + $0x38] sm:$0xff] (!%p1940_p9)  ;;  %2030 = vmatprep.mubr.msk.f32.mxu1 (!%p1940_p9), %vm535_vm2, %v2282_v23  ;;  %v2283_v27 = vld [vmem:[%s3088_s26 + $0x8] sm:$0xff] (!%p1940_p9)   ;;  %v2284_v29 = vld [vmem:[%s3088_s26 + $0x10] sm:$0xff] (!%p1940_p9)   ;;  %v3130_v42 = vsub.s32 (!%p1940_p9), 0, %v3104_v2  ;;  %v785_v43 = vsub.s32 (!%p1940_p9), 3, %v3104_v2  ;;  %v797_v45 = vsub.s32 (!%p1940_p9), 6, %v3104_v2 }
 0x100   : > { %2082 = vmatprep.subr.bf16.mxu1 (!%p1940_p9), %v2081_v20  ;;  %v2079_v28 = vpack.c.bf16 (!%p1940_p9), %v436_v26, %v435_v25  ;;  %v2285_v30 = vld [vmem:[%s3088_s26 + $0x18] sm:$0xff] (!%p1940_p9)   ;;  %v633_v34 = vunpack.c.0.s8 (!%p1940_p9), %v632_v33  ;;  %v793_v46 = vsub.s32 (!%p1940_p9), 5, %v3104_v2  ;;  %v782_v51 = vrot.slane (!%p1940_p9), %v3110_v5, %v781_v38  ;;  %v679_v3 = vld [vmem:[%s3082_s7] sm:$0xf] (!%p1940_p9)  ;;  %v681_v4 = vld [vmem:[%s3082_s7 + $0x8] sm:$0xf] (!%p1940_p9) }
 0x101   : > { %2084 = vmatpush3.bf16.msra.mxu1 (!%p1940_p9), %v2081_v20  ;;  %v428_v31 = vld [vmem:[%s3074_s21] sm:$0xff] (!%p1940_p9)  ;;  %v774_v52 = vrot.slane (!%p1940_p9), %v3110_v5, %v3130_v42  ;;  %v778_v53 = vrot.slane (!%p1940_p9), %v3110_v5, %v777_v39  ;;  %v790_v57 = vrot.slane (!%p1940_p9), %v3110_v5, %v789_v40  ;;  %v786_v58 = vrot.slane (!%p1940_p9), %v3110_v5, %v785_v43  ;;  %v680_v7 = vld [vmem:[%s3082_s7 + $0x4] sm:$0xf] (!%p1940_p9) }
 0x102   : > { %2074 = vmatpush3.bf16.msra.mxu0 (!%p1940_p9), %v2073_v16  ;;  %2086 = vmatprep.subr.bf16.mxu1 (!%p1940_p9), %v2085_v22  ;;  %v636_v36 = vsub.s32 (!%p1940_p9), %v633_v34, %v3104_v2  ;;  %v3144_v59 = vrot.slane (!%p1940_p9), %v3110_v5, %v797_v45  ;;  %v801_v60 = vsub.s32 (!%p1940_p9), 7, %v3104_v2  ;;  %v3148_v61 = vrot.slane (!%p1940_p9), %v3110_v5, %v793_v46  ;;  %v683_v15 = vld [vmem:[%s3082_s7 + $0x10] sm:$0xf] (!%p1940_p9)  ;;  %v682_v16 = vld [vmem:[%s3082_s7 + $0xc] sm:$0xf] (!%p1940_p9) }
 0x103   : > { %2075 = vmatprep.subr.bf16.mxu0 %v2679_v10  ;;  %v685_v26 = vld [vmem:[%s3082_s7 + $0x18] sm:$0xf] }
 0x104   : > { %v1946_v23 = vld [vmem:[%s3593_s24] ss:$0 sm:$0xff] }
 0x105   : > { %2088 = vmatpush3.bf16.msra.mxu1 %v2085_v22 }
 0x106   : > { %2077 = vmatpush3.bf16.msra.mxu0 %v2076_v24 }
 0x107   : > { %2078 = vmatprep.subr.bf16.mxu0 %v2679_v10 }
 0x108   : > { %2031 = vmatmul.mubr.msk.f32.vlgmr.msra.gmra.mrb[0].mxu1 %vm535_vm2, %v2283_v27  ;;  %v684_v27 = vld [vmem:[%s3082_s7 + $0x14] sm:$0xf] }
 0x109   : > { %2033 = vmatprep.mubr.msk.f32.mxu1 %vm535_vm2, %v2284_v29  ;;  %v686_v29 = vld [vmem:[%s3082_s7 + $0x1c] sm:$0xf] }
 0x10a   : > { %2080 = vmatpush3.bf16.msra.mxu0 %v2079_v28 }
 0x10c   : > { %2034 = vmatmul.mubr.msk.f32.gmra.mrb[2].mxu1 %vm535_vm2, %v2285_v30 }
 0x10d   : > { %2020 = vmatmul.mubr.msk.f32.vlgmr.msra.gmra.mrb[0].mxu0 %vm437_vm3, %v428_v31 }
 0x1db   : > { %v3123_v35 = vpop.f32.mrb[0].mxu1 }
 0x1dc   : > { %v610_v37 = vpop.f32.mrb[1].mxu1  ;;  %v740_v6 = vcombine.high %v3123_v35, %v3123_v35 }
 0x1dd   : > { %v739_v9 = vcombine.high %v610_v37, %v610_v37 }
 0x1df   : > { %v3133_v44 = vpop.f32.mrb[2].mxu1 }
 0x1e0   : > { %v507_v41 = vpop.f32.mrb[0].mxu0  ;;  %v620_v50 = vpop.f32.mrb[3].mxu1  ;;  %v742_v10 = vcombine.high %v3133_v44, %v3133_v44 }
 0x1e1   : > { %v630_v47 = vcombine.high %v507_v41, %v507_v41  ;;  %v637_v48 = vrot.slane %v507_v41, %v636_v36  ;;  %v2021_v49 = vpop.f32.mrb[1].mxu0  ;;  %v741_v20 = vcombine.high %v620_v50, %v620_v50 }
 0x1e3   : > { %v644_v54 = vrot.slane %v630_v47, %v636_v36  ;;  %v645_v55 = vcombine.high %v637_v48, %v637_v48  ;;  %v653_v56 = vrot.slane %v637_v48, %v636_v36 }
 0x1e5   : > { %v646_v62 = vcombine.high %v644_v54, %v644_v54  ;;  %v660_v63 = vrot.slane %v644_v54, %v636_v36  ;;  %v667_v0 = vrot.slane %v645_v55, %v636_v36  ;;  %v675_v1 = vcombine.high %v653_v56, %v653_v56 }
 0x1e6   : > { %v690_v8 = vrot.slane %v653_v56, %v3130_v42 }
 0x1e7   : > { %v674_v11 = vrot.slane %v646_v62, %v636_v36  ;;  %v677_v12 = vcombine.high %v667_v0, %v667_v0  ;;  %v698_v13 = vrot.slane %v675_v1, %v3130_v42  ;;  %v694_v14 = vrot.slane %v667_v0, %v3130_v42 }
 0x1e8   : > { %v727_v17 = vadd.f32 %v690_v8, %v679_v3  ;;  %v676_v18 = vcombine.high %v660_v63, %v660_v63  ;;  %v706_v19 = vrot.slane %v660_v63, %v3130_v42 }
 0x1e9   : > { %v702_v21 = vrot.slane %v677_v12, %v3130_v42  ;;  %v729_v22 = vadd.f32 %v698_v13, %v681_v4  ;;  %v728_v24 = vadd.f32 %v694_v14, %v680_v7  ;;  %v678_v25 = vcombine.high %v674_v11, %v674_v11 }
 0x1ea   : > { %v747_v28 = vadd.f32 %v727_v17, %v610_v37  ;;  %v714_v30 = vrot.slane %v676_v18, %v3130_v42  ;;  %v710_v31 = vrot.slane %v674_v11, %v3130_v42  ;;  %v731_v32 = vadd.f32 %v706_v19, %v683_v15 }
 0x1eb   : > { %v730_v33 = vadd.f32 %v702_v21, %v682_v16  ;;  %v749_v34 = vadd.f32 %v3123_v35, %v729_v22  ;;  %v748_v36 = vadd.f32 %v739_v9, %v728_v24  ;;  %v718_v38 = vrot.slane %v678_v25, %v3130_v42 }
 0x1ec   : > { %v762_v39 = vadd.f32 %v1946_v23, %v747_v28  ;;  %v733_v40 = vadd.f32 %v714_v30, %v685_v26  ;;  %v732_v41 = vadd.f32 %v710_v31, %v684_v27  ;;  %v751_v43 = vadd.f32 %v731_v32, %v620_v50  ;;  %v819_v31 = vld [vmem:[#allocation2] sm:$0x1] }
 0x1ed   : > { %v750_v45 = vadd.f32 %v740_v6, %v730_v33  ;;  %v764_v46 = vadd.f32 %v1946_v23, %v749_v34  ;;  %v763_v47 = vadd.f32 %v1946_v23, %v748_v36  ;;  %v734_v37 = vadd.f32 %v718_v38, %v686_v29  ;;  %v847_v34 = vld [vmem:[#allocation3] sm:$0x1] }
 0x1ee   : > { %v811_v48 = vmul.f32 %v774_v52, %v762_v39  ;;  %v753_v49 = vadd.f32 %v3133_v44, %v733_v40  ;;  %v752_v54 = vadd.f32 %v741_v20, %v732_v41  ;;  %v766_v55 = vadd.f32 %v1946_v23, %v751_v43 }
 0x1ef   : > { %v765_v56 = vadd.f32 %v1946_v23, %v750_v45  ;;  %v813_v62 = vmul.f32 %v782_v51, %v764_v46  ;;  %v812_v63 = vmul.f32 %v778_v53, %v763_v47  ;;  %v754_v35 = vadd.f32 %v742_v10, %v734_v37 }
 0x1f0   : > { %v768_v0 = vadd.f32 %v1946_v23, %v753_v49  ;;  %v802_v42 = vrot.slane %v3110_v5, %v801_v60  ;;  %v767_v1 = vadd.f32 %v1946_v23, %v752_v54  ;;  %v815_v3 = vmul.f32 %v790_v57, %v766_v55 }
 0x1f1   : > { %v814_v4 = vmul.f32 %v786_v58, %v765_v56  ;;  %v828_v50 = vcombine.low %v811_v48, %v812_v63  ;;  %v848_v6 = vmul.f32 %v811_v48, %v811_v48  ;;  %v849_v7 = vmul.f32 %v812_v63, %v812_v63 }
 0x1f2   : > { %v769_v8 = vadd.f32 %v1946_v23, %v754_v35  ;;  %v817_v52 = vmul.f32 %v3144_v59, %v768_v0  ;;  %v816_v44 = vmul.f32 %v3148_v61, %v767_v1  ;;  %v850_v11 = vmul.f32 %v813_v62, %v813_v62 }
 0x1f3   : > { %v829_v9 = vcombine.low %v813_v62, %v814_v4  ;;  %v851_v12 = vmul.f32 %v814_v4, %v814_v4  ;;  %v864_v51 = vcombine.low %v848_v6, %v849_v7  ;;  %v852_v13 = vmul.f32 %v815_v3, %v815_v3 }
 0x1f4   : > { %v818_v53 = vmul.f32 %v802_v42, %v769_v8  ;;  %v830_v10 = vcombine.low %v815_v3, %v816_v44  ;;  %v853_v14 = vmul.f32 %v816_v44, %v816_v44  ;;  %v854_v58 = vmul.f32 %v817_v52, %v817_v52 }
 0x1f5   : > { %v865_v60 = vcombine.low %v850_v11, %v851_v12  ;;  %v836_v15 = vadd.f32 %v829_v9, %v828_v50 }
 0x1f6   : > { %v831_v57 = vcombine.low %v817_v52, %v818_v53  ;;  %v855_v16 = vmul.f32 %v818_v53, %v818_v53  ;;  %v866_v17 = vcombine.low %v852_v13, %v853_v14 }
 0x1f7   : > { %v872_v18 = vadd.f32 %v865_v60, %v864_v51  ;;  %v837_v19 = vadd.f32 %v836_v15, %v830_v10 }
 0x1f8   : > { %v867_v20 = vcombine.low %v854_v58, %v855_v16 }
 0x1f9   : > { %v838_v59 = vadd.f32 %v837_v19, %v831_v57  ;;  %v873_v21 = vadd.f32 %v872_v18, %v866_v17 }
 0x1fb   : > { %v839_v61 = vrot.slane %v838_v59, 4  ;;  %v874_v22 = vadd.f32 %v873_v21, %v867_v20 }
 0x1fd   : > { %v840_v23 = vadd.f32 %v839_v61, %v838_v59  ;;  %v875_v24 = vrot.slane %v874_v22, 4 }
 0x1ff   : > { %v841_v25 = vrot.slane %v840_v23, 2  ;;  %v876_v26 = vadd.f32 %v875_v24, %v874_v22 }
 0x201   : > { %v842_v27 = vadd.f32 %v841_v25, %v840_v23  ;;  %v877_v28 = vrot.slane %v876_v26, 2 }
 0x203   : > { %v843_v29 = vrot.slane %v842_v27, 1  ;;  %v878_v30 = vadd.f32 %v877_v28, %v876_v26 }
 0x205   : > { %v844_v32 = vadd.f32 %v843_v29, %v842_v27  ;;  %v879_v33 = vrot.slane %v878_v30, 1 }
 0x207   : > { %v845_v36 = vadd.f32 %v844_v32, %v819_v31  ;;  %v880_v38 = vadd.f32 %v879_v33, %v878_v30 }
 0x209   : > { %846 = vst [vmem:[#allocation2] sm:$0x1] %v845_v36  ;;  %v881_v39 = vadd.f32 %v880_v38, %v847_v34 }
 0x20b   : > { %882 = vst [vmem:[#allocation3] sm:$0x1] %v881_v39 }
 0x20c PF: > { %s3594_s3 = sld [smem:[#allocation27_spill]] }
 0x212   : > { %p883_p3 = scmp.eq.s32.totalorder %s3594_s3, 1 }
 0x214   : > { %p884_p12 = pnand %p883_p3, %p418_p8 }
 0x215   : > { %vm888_vm4 = vcmask (!%p884_p12), 516096   ;;  %v2683_v40 = vmov (!%p884_p12), 0.0  }
 0x216   : > { %887 = sbr.rel (%p884_p12) target bundleno = 541 (0x21d), region = 76  ;;  %889 = vst.msk [vmem:[#allocation4] sm:$0x1] (!%p884_p12), %vm888_vm4, %v2683_v40  ;;  %890 = vst.msk [vmem:[#allocation5] sm:$0x1] (!%p884_p12), %vm888_vm4, %v2683_v40 }
 0x21d PF: > { %s3596_s1 = sld [smem:[#allocation27_spill]] }
 0x223   : > { %p1947_p5 = scmp.ne.s32.totalorder %s3596_s1, 1 }
 0x224   : > { %v903_v41 = vld [vmem:[#allocation13] sm:$0xff] (!%p1947_p5)  ;;  %v904_v43 = vld [vmem:[#allocation13 + $0x8] sm:$0xff] (!%p1947_p5)  ;;  %v905_v45 = vld [vmem:[#allocation13 + $0x10] sm:$0xff] (!%p1947_p5)  ;;  %v2684_v46 = vmov (!%p1947_p5), 0.0|0.0   ;;  %vm2685_vm5 = vmmov (!%p1947_p5), 0   ;;  %v2686_v48 = vmov (!%p1947_p5), 0.0  }
 0x225   : > { %893 = sbr.rel (%p1947_p5) target bundleno = 1005 (0x3ed), region = 80  ;;  %2089 = vmatprep.subr.bf16.mxu0 (!%p1947_p5), %v2684_v46  ;;  %v2090_v47 = vpack.c.bf16 (!%p1947_p5), %v904_v43, %v903_v41  ;;  %v906_v37 = vld [vmem:[#allocation13 + $0x18] sm:$0xff] (!%p1947_p5)  ;;  %2052 = vmatprep.mubr.msk.f32.mxu0 (!%p1947_p5), %vm2685_vm5, %v2686_v48  ;;  %v907_v49 = vld [vmem:[#allocation13 + $0x20] sm:$0xff] (!%p1947_p5)  ;;  %v908_v56 = vld [vmem:[#allocation13 + $0x28] sm:$0xff] (!%p1947_p5)  ;;  %vm1009_vm6 = vcmask (!%p1947_p5), 261120   ;;  %vm911_vm7 = vcmask (!%p1947_p5), 523264  }
 0x226   : > { %v993_v54 = vld [vmem:[#allocation15] sm:$0xff] (!%p1947_p5)  ;;  %v2093_v55 = vpack.c.bf16 (!%p1947_p5), %v906_v37, %v905_v45  ;;  %v994_v62 = vld [vmem:[#allocation15 + $0x8] sm:$0xff] (!%p1947_p5)  ;;  %v995_v63 = vld [vmem:[#allocation15 + $0x10] sm:$0xff] (!%p1947_p5)  ;;  %v2096_v3 = vpack.c.bf16 (!%p1947_p5), %v908_v56, %v907_v49  ;;  %v2687_v14 = vmov (!%p1947_p5), 1966171168   ;;  %v1163_v22 = vsub.s32 (!%p1947_p5), 0, %v3104_v2 }
 0x227   : > { %2091 = vmatpush3.bf16.msra.mxu0 (!%p1947_p5), %v2090_v47  ;;  %v2101_v35 = vpack.c.bf16 (!%p1947_p5), %v994_v62, %v993_v54  ;;  %v996_v0 = vld [vmem:[#allocation15 + $0x18] sm:$0xff] (!%p1947_p5)  ;;  %v2286_v1 = vld [vmem:[%s3088_s26] sm:$0xff] (!%p1947_p5)   ;;  %v909_v4 = vld [vmem:[#allocation13 + $0x30] sm:$0xff] (!%p1947_p5)  ;;  %v1106_v60 = vunpack.c.l.s4 (!%p1947_p5), %v2687_v14  ;;  %s3597_s25 = sld [smem:[#allocation39_spill]] (!%p1947_p5)  ;;  %s2688_s14 = smov (!%p1947_p5), 64  }
 0x228   : > { %2092 = vmatprep.subr.bf16.mxu0 (!%p1947_p5), %v2684_v46  ;;  %v2105_v42 = vpack.c.bf16 (!%p1947_p5), %v996_v0, %v995_v63  ;;  %v910_v50 = vld [vmem:[#allocation13 + $0x38] sm:$0xff] (!%p1947_p5)  ;;  %2063 = vmatprep.mubr.msk.f32.mxu1 (!%p1947_p5), %vm1009_vm6, %v2286_v1  ;;  %v2287_v6 = vld [vmem:[%s3088_s26 + $0x8] sm:$0xff] (!%p1947_p5)   ;;  %v2288_v8 = vld [vmem:[%s3088_s26 + $0x10] sm:$0xff] (!%p1947_p5)   ;;  %s1584_s5 = scalar_lea.vmem (!%p1947_p5), [#allocation6], %s3096_s15 }
 0x229   : > { %2102 = vmatprep.subr.bf16.mxu1 (!%p1947_p5), %v2101_v35  ;;  %v2099_v7 = vpack.c.bf16 (!%p1947_p5), %v910_v50, %v909_v4  ;;  %v2289_v52 = vld [vmem:[%s3088_s26 + $0x18] sm:$0xff] (!%p1947_p5)   ;;  %v894_v9 = vld [vmem:[#allocation2] sm:$0x1] (!%p1947_p5)  ;;  %v896_v12 = vld [vmem:[#allocation3] sm:$0x1] (!%p1947_p5)  ;;  %v1107_v15 = vunpack.c.0.s8 (!%p1947_p5), %v1106_v60 }
 0x22a   : > { %2104 = vmatpush3.bf16.msra.mxu1 (!%p1947_p5), %v2101_v35  ;;  %v902_v44 = vld [vmem:[%s3074_s21] sm:$0xff] (!%p1947_p5)  ;;  %v895_v11 = vmul.f32 (!%p1947_p5), 0.0125, %v894_v9  ;;  %v897_v51 = vmul.f32 (!%p1947_p5), 0.0125, %v896_v12 }
 0x22b   : > { %2094 = vmatpush3.bf16.msra.mxu0 (!%p1947_p5), %v2093_v55  ;;  %2106 = vmatprep.subr.bf16.mxu1 (!%p1947_p5), %v2105_v42  ;;  %v1110_v58 = vsub.s32 (!%p1947_p5), %v1107_v15, %v3104_v2  ;;  %v1153_v32 = vld [vmem:[%s3082_s7] sm:$0xf] (!%p1947_p5)  ;;  %v1155_v33 = vld [vmem:[%s3082_s7 + $0x8] sm:$0xf] (!%p1947_p5)  ;;  %v1154_v36 = vld [vmem:[%s3082_s7 + $0x4] sm:$0xf] (!%p1947_p5) }
 0x22c   : > { %2095 = vmatprep.subr.bf16.mxu0 %v2684_v46  ;;  %v898_v53 = vmul.f32 %v895_v11, %v895_v11  ;;  %v3196_v26 = vrot.slane %v895_v11, %v1163_v22  ;;  %v1157_v47 = vld [vmem:[%s3082_s7 + $0x10] sm:$0xf]  ;;  %v1156_v37 = vld [vmem:[%s3082_s7 + $0xc] sm:$0xf]  ;;  %v1158_v1 = vld [vmem:[%s3082_s7 + $0x14] sm:$0xf] }
 0x22d   : > { %v1953_v63 = vld [vmem:[%s3597_s25] ss:$0 sm:$0xff]  ;;  %v1160_v4 = vld [vmem:[%s3082_s7 + $0x1c] sm:$0xf] }
 0x22e   : > { %2108 = vmatpush3.bf16.msra.mxu1 %v2105_v42  ;;  %v899_v10 = vsub.f32 %v897_v51, %v898_v53  ;;  %v1159_v42 = vld [vmem:[%s3082_s7 + $0x18] sm:$0xf] }
 0x22f   : > { %2097 = vmatpush3.bf16.msra.mxu0 %v2096_v3 }
 0x230   : > { %2098 = vmatprep.subr.bf16.mxu0 %v2684_v46  ;;  %v900_v13 = vadd.f32 1e-05, %v899_v10 }
 0x231   : > { %2064 = vmatmul.mubr.msk.f32.vlgmr.msra.gmra.mrb[0].mxu1 %vm1009_vm6, %v2287_v6 }
 0x232   : > { %2066 = vmatprep.mubr.msk.f32.mxu1 %vm1009_vm6, %v2288_v8  ;;  %2290 = vrsqrt.f32 %v900_v13 }
 0x233   : > { %2100 = vmatpush3.bf16.msra.mxu0 %v2099_v7 }
 0x235   : > { %2067 = vmatmul.mubr.msk.f32.gmra.mrb[2].mxu1 %vm1009_vm6, %v2289_v52 }
 0x236   : > { %2053 = vmatmul.mubr.msk.f32.vlgmr.msra.gmra.mrb[0].mxu0 %vm911_vm7, %v902_v44 }
 0x23c   : > { %v2291_v19 = vpop.eup %2290 }
 0x23d   : > { %v3198_v27 = vrot.slane %v2291_v19, %v1163_v22 }
 0x304   : > { %v2065_v57 = vpop.f32.mrb[0].mxu1 }
 0x305   : > { %v1084_v16 = vpop.f32.mrb[1].mxu1  ;;  %v1214_v34 = vcombine.high %v2065_v57, %v2065_v57 }
 0x306   : > { %v1213_v39 = vcombine.high %v1084_v16, %v1084_v16 }
 0x308   : > { %v3193_v18 = vpop.f32.mrb[2].mxu1 }
 0x309   : > { %v981_v17 = vpop.f32.mrb[0].mxu0  ;;  %v1094_v61 = vpop.f32.mrb[3].mxu1  ;;  %v1216_v40 = vcombine.high %v3193_v18, %v3193_v18 }
 0x30a   : > { %v1104_v20 = vcombine.high %v981_v17, %v981_v17  ;;  %v1111_v59 = vrot.slane %v981_v17, %v1110_v58  ;;  %v2054_v21 = vpop.f32.mrb[1].mxu0  ;;  %v1215_v55 = vcombine.high %v1094_v61, %v1094_v61 }
 0x30c   : > { %v1118_v23 = vrot.slane %v1104_v20, %v1110_v58  ;;  %v1119_v24 = vcombine.high %v1111_v59, %v1111_v59  ;;  %v1127_v25 = vrot.slane %v1111_v59, %v1110_v58 }
 0x30e   : > { %v1120_v28 = vcombine.high %v1118_v23, %v1118_v23  ;;  %v1134_v29 = vrot.slane %v1118_v23, %v1110_v58  ;;  %v1141_v30 = vrot.slane %v1119_v24, %v1110_v58  ;;  %v1149_v31 = vcombine.high %v1127_v25, %v1127_v25 }
 0x30f   : > { %v1164_v38 = vrot.slane %v1127_v25, %v1163_v22 }
 0x310   : > { %v1148_v41 = vrot.slane %v1120_v28, %v1110_v58  ;;  %v1151_v43 = vcombine.high %v1141_v30, %v1141_v30  ;;  %v1172_v45 = vrot.slane %v1149_v31, %v1163_v22  ;;  %v1168_v46 = vrot.slane %v1141_v30, %v1163_v22 }
 0x311   : > { %v1201_v48 = vadd.f32 %v1164_v38, %v1153_v32  ;;  %v1150_v49 = vcombine.high %v1134_v29, %v1134_v29  ;;  %v1180_v54 = vrot.slane %v1134_v29, %v1163_v22 }
 0x312   : > { %v1176_v56 = vrot.slane %v1151_v43, %v1163_v22  ;;  %v1203_v62 = vadd.f32 %v1172_v45, %v1155_v33  ;;  %v1202_v35 = vadd.f32 %v1168_v46, %v1154_v36  ;;  %v1152_v0 = vcombine.high %v1148_v41, %v1148_v41 }
 0x313   : > { %v1221_v3 = vadd.f32 %v1201_v48, %v1084_v16  ;;  %v1188_v50 = vrot.slane %v1150_v49, %v1163_v22  ;;  %v1184_v6 = vrot.slane %v1148_v41, %v1163_v22  ;;  %v1205_v7 = vadd.f32 %v1180_v54, %v1157_v47 }
 0x314   : > { %v1204_v8 = vadd.f32 %v1176_v56, %v1156_v37  ;;  %v1223_v52 = vadd.f32 %v2065_v57, %v1203_v62  ;;  %v1222_v44 = vadd.f32 %v1213_v39, %v1202_v35  ;;  %v1192_v9 = vrot.slane %v1152_v0, %v1163_v22 }
 0x315   : > { %v1236_v11 = vadd.f32 %v1953_v63, %v1221_v3  ;;  %v1207_v12 = vadd.f32 %v1188_v50, %v1159_v42  ;;  %v1206_v51 = vadd.f32 %v1184_v6, %v1158_v1  ;;  %v1225_v53 = vadd.f32 %v1205_v7, %v1094_v61 }
 0x316   : > { %v1224_v10 = vadd.f32 %v1214_v34, %v1204_v8  ;;  %v1238_v13 = vadd.f32 %v1953_v63, %v1223_v52  ;;  %v1237_v14 = vadd.f32 %v1953_v63, %v1222_v44  ;;  %v1208_v60 = vadd.f32 %v1192_v9, %v1160_v4 }
 0x317   : > { %v1250_v15 = vsub.f32 %v1236_v11, %v3196_v26  ;;  %v1227_v58 = vadd.f32 %v3193_v18, %v1207_v12  ;;  %v1226_v16 = vadd.f32 %v1215_v55, %v1206_v51  ;;  %v1240_v17 = vadd.f32 %v1953_v63, %v1225_v53 }
 0x318   : > { %v1239_v19 = vadd.f32 %v1953_v63, %v1224_v10  ;;  %v1252_v20 = vsub.f32 %v1238_v13, %v3196_v26  ;;  %v1251_v57 = vsub.f32 %v1237_v14, %v3196_v26  ;;  %v1228_v59 = vadd.f32 %v1216_v40, %v1208_v60 }
 0x319   : > { %v3218_v21 = vmul.f32 %v3198_v27, %v1250_v15  ;;  %v1242_v61 = vadd.f32 %v1953_v63, %v1227_v58  ;;  %v1241_v22 = vadd.f32 %v1953_v63, %v1226_v16  ;;  %v1254_v23 = vsub.f32 %v1240_v17, %v3196_v26 }
 0x31a   : > { %v1253_v24 = vsub.f32 %v1239_v19, %v3196_v26  ;;  %v3223_v25 = vmul.f32 %v3198_v27, %v1252_v20  ;;  %v3226_v18 = vmul.f32 %v3198_v27, %v1251_v57  ;;  %v1243_v28 = vadd.f32 %v1953_v63, %v1228_v59 }
 0x31b   : > { %v1344_v29 = vand.u32 2147483647, %v3218_v21  ;;  %v1256_v30 = vsub.f32 %v1242_v61, %v3196_v26  ;;  %v1255_v31 = vsub.f32 %v1241_v22, %v3196_v26  ;;  %v3232_v32 = vmul.f32 %v3198_v27, %v1254_v23 }
 0x31c   : > { %v3235_v33 = vmul.f32 %v3198_v27, %v1253_v24  ;;  %v1346_v34 = vand.u32 2147483647, %v3223_v25  ;;  %v1345_v36 = vand.u32 2147483647, %v3226_v18  ;;  %v1257_v38 = vsub.f32 %v1243_v28, %v3196_v26 }
 0x31d   : > { %v1352_v39 = vsub.f32 0.0, %v1344_v29  ;;  %v3241_v40 = vmul.f32 %v3198_v27, %v1256_v30  ;;  %v3244_v41 = vmul.f32 %v3198_v27, %v1255_v31  ;;  %v1348_v43 = vand.u32 2147483647, %v3232_v32 }
 0x31e   : > { %v1347_v45 = vand.u32 2147483647, %v3235_v33  ;;  %v1354_v46 = vsub.f32 0.0, %v1346_v34  ;;  %v1353_v47 = vsub.f32 0.0, %v1345_v36  ;;  %v3249_v37 = vmul.f32 %v3198_v27, %v1257_v38 }
 0x31f   : > { %v1360_v48 = vmul.f32 1.442695, %v1352_v39  ;;  %v1350_v49 = vand.u32 2147483647, %v3241_v40  ;;  %v1349_v26 = vand.u32 2147483647, %v3244_v41  ;;  %vm1328_vm8 = vcmp.ne.f32.partialorder %v3218_v21, %v3218_v21 }
 0x320   : > { %v1355_v54 = vsub.f32 0.0, %v1347_v45  ;;  %v1364_v55 = vmul.f32 1.442695, %v1354_v46  ;;  %v1362_v56 = vmul.f32 1.442695, %v1353_v47  ;;  %v1356_v62 = vsub.f32 0.0, %v1348_v43 }
 0x321   : > { %2292 = vpow2.f32 %v1360_v48  ;;  %v1351_v63 = vand.u32 2147483647, %v3249_v37  ;;  %v1357_v35 = vsub.f32 0.0, %v1349_v26  ;;  %v1358_v1 = vsub.f32 0.0, %v1350_v49 }
 0x322   : > { %2294 = vpow2.f32 %v1364_v55  ;;  %v1366_v0 = vmul.f32 1.442695, %v1355_v54  ;;  %v1368_v42 = vmul.f32 1.442695, %v1356_v62  ;;  %v1320_v13 = vmax.f32 %v3218_v21, 0.0 }
 0x323   : > { %2296 = vpow2.f32 %v1362_v56  ;;  %v1359_v27 = vsub.f32 0.0, %v1351_v63  ;;  %v1370_v3 = vmul.f32 1.442695, %v1357_v35  ;;  %v1372_v50 = vmul.f32 1.442695, %v1358_v1 }
 0x324   : > { %2298 = vpow2.f32 %v1366_v0  ;;  %v1321_v15 = vmax.f32 %v3226_v18, 0.0  ;;  %v1323_v16 = vmax.f32 %v3235_v33, 0.0  ;;  %v1322_v61 = vmax.f32 %v3223_v25, 0.0 }
 0x325   : > { %v1374_v4 = vmul.f32 1.442695, %v1359_v27  ;;  %2300 = vpow2.f32 %v1368_v42  ;;  %v1325_v22 = vmax.f32 %v3244_v41, 0.0  ;;  %v1324_v36 = vmax.f32 %v3232_v32, 0.0 }
 0x326   : > { %vm1329_vm10 = vcmp.ne.f32.partialorder %v3226_v18, %v3226_v18  ;;  %vm1331_vm12 = vcmp.ne.f32.partialorder %v3235_v33, %v3235_v33  ;;  %vm1330_vm1 = vcmp.ne.f32.partialorder %v3223_v25, %v3223_v25  ;;  %vm1333_vm3 = vcmp.ne.f32.partialorder %v3244_v41, %v3244_v41 }
 0x327   : > { %2302 = vpow2.f32 %v1374_v4  ;;  %vm1332_vm5 = vcmp.ne.f32.partialorder %v3232_v32, %v3232_v32  ;;  %vm1335_vm6 = vcmp.ne.f32.partialorder %v3249_v37, %v3249_v37 }
 0x328   : > { %2304 = vpow2.f32 %v1370_v3 }
 0x329   : > { %2306 = vpow2.f32 %v1372_v50 }
 0x32b   : > { %v2293_v6 = vpop.eup %2292 }
 0x32c   : > { %v2295_v7 = vpop.eup %2294  ;;  %v1376_v8 = vadd.f32 1.0, %v2293_v6  ;;  %v1379_v12 = vmul.f32 -0.5, %v2293_v6  ;;  %v1382_v19 = vand.u32 2147483647, %v2293_v6 }
 0x32d   : > { %v2297_v52 = vpop.eup %2296  ;;  %v1394_v11 = vadd.f32 1.0, %v2295_v7  ;;  %v1397_v14 = vmul.f32 -0.5, %v2295_v7  ;;  %v1400_v34 = vand.u32 2147483647, %v2295_v7 }
 0x32e   : > { %v2299_v44 = vpop.eup %2298  ;;  %2308 = vlog2.f32 %v1376_v8  ;;  %v1385_v9 = vadd.f32 1.0, %v2297_v52  ;;  %v1388_v58 = vmul.f32 -0.5, %v2297_v52  ;;  %v1380_v17 = vadd.f32 1.0, %v1379_v12 }
 0x32f   : > { %v1403_v51 = vadd.f32 1.0, %v2299_v44  ;;  %v3254_v53 = vpop.eup %2300  ;;  %v1406_v20 = vmul.f32 -0.5, %v2299_v44  ;;  %v1391_v59 = vand.u32 2147483647, %v2297_v52  ;;  %v1409_v28 = vand.u32 2147483647, %v2299_v44 }
 0x330   : > { %2310 = vlog2.f32 %v1385_v9  ;;  %v1412_v23 = vadd.f32 1.0, %v3254_v53  ;;  %v1398_v29 = vadd.f32 1.0, %v1397_v14  ;;  %v1389_v31 = vadd.f32 1.0, %v1388_v58 }
 0x331   : > { %v3256_v10 = vpop.eup %2302  ;;  %2312 = vlog2.f32 %v1403_v51  ;;  %v1381_v38 = vmul.f32 %v2293_v6, %v1380_v17  ;;  %vm3273_vm9 = vcmp.lt.f32.partialorder %v1382_v19, 0.0004427343  ;;  %v1407_v43 = vadd.f32 1.0, %v1406_v20 }
 0x332   : > { %v3259_v60 = vpop.eup %2304  ;;  %2314 = vlog2.f32 %v1394_v11  ;;  %v1439_v30 = vadd.f32 1.0, %v3256_v10  ;;  %vm3279_vm11 = vcmp.lt.f32.partialorder %v1391_v59, 0.0004427343  ;;  %vm3288_vm13 = vcmp.lt.f32.partialorder %v1409_v28, 0.0004427343 }
 0x333   : > { %v1421_v57 = vadd.f32 1.0, %v3259_v60  ;;  %v3267_v24 = vpop.eup %2306  ;;  %v1424_v47 = vmul.f32 -0.5, %v3259_v60  ;;  %v1427_v48 = vand.u32 2147483647, %v3259_v60  ;;  %v1399_v55 = vmul.f32 %v2295_v7, %v1398_v29 }
 0x334   : > { %v1430_v49 = vadd.f32 1.0, %v3267_v24  ;;  %v1415_v56 = vmul.f32 -0.5, %v3254_v53  ;;  %v1390_v63 = vmul.f32 %v2297_v52, %v1389_v31  ;;  %vm3293_vm14 = vcmp.lt.f32.partialorder %v1400_v34, 0.0004427343 }
 0x335   : > { %2316 = vlog2.f32 %v1421_v57  ;;  %v1442_v0 = vmul.f32 -0.5, %v3256_v10  ;;  %v1408_v3 = vmul.f32 %v2299_v44, %v1407_v43  ;;  %v1418_v4 = vand.u32 2147483647, %v3254_v53 }
 0x336   : > { %2318 = vlog2.f32 %v1412_v23  ;;  %v1425_v8 = vadd.f32 1.0, %v1424_v47  ;;  %vm3301_vm15 = vcmp.lt.f32.partialorder %v1427_v48, 0.0004427343  ;;  %v1416_v12 = vadd.f32 1.0, %v1415_v56 }
 0x337   : > { %2320 = vlog2.f32 %v1439_v30  ;;  %v1433_v51 = vmul.f32 -0.5, %v3267_v24  ;;  %v1443_v58 = vadd.f32 1.0, %v1442_v0  ;;  %vm3317_vm0 = vcmp.lt.f32.partialorder %v1418_v4, 0.0004427343 }
 0x338   : > { %v2309_v45 = vpop.eup %2308  ;;  %2322 = vlog2.f32 %v1430_v49  ;;  %v1445_v59 = vand.u32 2147483647, %v3256_v10  ;;  %v1426_v30 = vmul.f32 %v3259_v60, %v1425_v8  ;;  %v1436_v60 = vand.u32 2147483647, %v3267_v24 }
 0x339   : > { %v1378_v26 = vmul.f32 0.6931472, %v2309_v45  ;;  %v1434_v39 = vadd.f32 1.0, %v1433_v51  ;;  %v1327_v49 = vmax.f32 %v3249_v37, 0.0  ;;  %v1959_v4 = vmul.f32 -1.442695, %v3244_v41 }
 0x33a   : > { %v2311_v62 = vpop.eup %2310  ;;  %vm1446_vm2 = vcmp.lt.f32.partialorder %v1445_v59, 0.0004427343  ;;  %vm1437_vm4 = vcmp.lt.f32.partialorder %v1436_v60, 0.0004427343 }
 0x33b   : > { %v2313_v42 = vpop.eup %2312  ;;  %v1384_v1 = vsel %vm3273_vm9, %v1381_v38, %v1378_v26  ;;  %v1387_v27 = vmul.f32 0.6931472, %v2311_v62  ;;  %v1417_v38 = vmul.f32 %v3254_v53, %v1416_v12  ;;  %v1326_v62 = vmax.f32 %v3241_v40, 0.0 }
 0x33c   : > { %v2315_v50 = vpop.eup %2314  ;;  %v1448_v6 = vadd.f32 %v1384_v1, %v1320_v13  ;;  %v1405_v7 = vmul.f32 0.6931472, %v2313_v42  ;;  %v1954_v42 = vmul.f32 -1.442695, %v3218_v21  ;;  %v1955_v1 = vmul.f32 -1.442695, %v3226_v18 }
 0x33d   : > { %v1393_v9 = vsel %vm3279_vm11, %v1390_v63, %v1387_v27  ;;  %v1396_v11 = vmul.f32 0.6931472, %v2315_v50  ;;  %v1957_v27 = vmul.f32 -1.442695, %v3235_v33  ;;  %v1958_v50 = vmul.f32 -1.442695, %v3232_v32 }
 0x33e   : > { %v1456_v44 = vsel %vm1328_vm8, %v3218_v21, %v1448_v6  ;;  %v1449_v14 = vadd.f32 %v1393_v9, %v1321_v15  ;;  %v1411_v13 = vsel %vm3288_vm13, %v1408_v3, %v1405_v7  ;;  %vm1334_vm8 = vcmp.ne.f32.partialorder %v3241_v40, %v3241_v40 }
 0x33f   : > { %v2317_v17 = vpop.eup %2316  ;;  %1472 = vrot.lane.b32.xlu1 %v1456_v44, %s2688_s14  ;;  %v1451_v19 = vadd.f32 %v1411_v13, %v1323_v16  ;;  %v1402_v20 = vsel %vm3293_vm14, %v1399_v55, %v1396_v11  ;;  %2324 = vpow2.f32 %v1954_v42  ;;  %v1956_v3 = vmul.f32 -1.442695, %v3223_v25 }
 0x340   : > { %v2319_v23 = vpop.eup %2318  ;;  %v1457_v15 = vsel %vm1329_vm10, %v3226_v18, %v1449_v14  ;;  %v1450_v28 = vadd.f32 %v1402_v20, %v1322_v61  ;;  %v1423_v29 = vmul.f32 0.6931472, %v2317_v17  ;;  %v1444_v61 = vmul.f32 %v3256_v10, %v1443_v58 }
 0x341   : > { %v2321_v16 = vpop.eup %2320  ;;  %1474 = vrot.lane.b32.xlu0 %v1457_v15, %s2688_s14  ;;  %v1459_v31 = vsel %vm1331_vm12, %v3235_v33, %v1451_v19  ;;  %v1414_v34 = vmul.f32 0.6931472, %v2319_v23  ;;  %2326 = vpow2.f32 %v1955_v1  ;;  %v1961_v6 = vmul.f32 -1.442695, %v3249_v37 }
 0x342   : > { %v1429_v43 = vsel %vm3301_vm15, %v1426_v30, %v1423_v29  ;;  %v1441_v45 = vmul.f32 0.6931472, %v2321_v16  ;;  %v2323_v47 = vpop.eup %2322  ;;  %v1458_v48 = vsel %vm1330_vm1, %v3223_v25, %v1450_v28  ;;  %2328 = vpow2.f32 %v1957_v27 }
 0x343   : > { %1478 = vrot.lane.b32.xlu1 %v1459_v31, %s2688_s14  ;;  %v1453_v46 = vadd.f32 %v1429_v43, %v1325_v22  ;;  %v1420_v53 = vsel %vm3317_vm0, %v1417_v38, %v1414_v34  ;;  %v1432_v54 = vmul.f32 0.6931472, %v2323_v47  ;;  %v1435_v22 = vmul.f32 %v3267_v24, %v1434_v39 }
 0x344   : > { %v1452_v10 = vadd.f32 %v1420_v53, %v1324_v36  ;;  %v1447_v26 = vsel %vm1446_vm2, %v1444_v61, %v1441_v45  ;;  %2330 = vpow2.f32 %v1956_v3  ;;  %v1960_v21 = vmul.f32 -1.442695, %v3241_v40 }
 0x345   : > { %1476 = vrot.lane.b32.xlu0 %v1458_v48, %s2688_s14  ;;  %v1461_v55 = vsel %vm1333_vm3, %v3244_v41, %v1453_v46  ;;  %v1455_v56 = vadd.f32 %v1447_v26, %v1327_v49  ;;  %v1438_v36 = vsel %vm1437_vm4, %v1435_v22, %v1432_v54  ;;  %2332 = vpow2.f32 %v1959_v4 }
 0x346   : > { %v1460_v63 = vsel %vm1332_vm5, %v3232_v32, %v1452_v10  ;;  %v1454_v35 = vadd.f32 %v1438_v36, %v1326_v62  ;;  %2334 = vpow2.f32 %v1958_v50  ;;  %vm1504_vm9 = vcmask 519168  }
 0x347   : > { %1482 = vrot.lane.b32.xlu1 %v1461_v55, %s2688_s14  ;;  %v1463_v24 = vsel %vm1335_vm6, %v3249_v37, %v1455_v56  ;;  %2336 = vpow2.f32 %v1961_v6  ;;  %vm1569_vm10 = vcmask 1041409   ;;  %v1587_v47 = vrot.slane %v3110_v5, 1 }
 0x348   : > { %v1462_v0 = vsel %vm1334_vm8, %v3241_v40, %v1454_v35  ;;  %2338 = vpow2.f32 %v1960_v21  ;;  %v1589_v62 = vrot.slane %v3110_v5, 3  ;;  %v1588_v36 = vrot.slane %v3110_v5, 2 }
 0x349   : > { %1480 = vrot.lane.b32.xlu0 %v1460_v63, %s2688_s14  ;;  %v2325_v7 = vpop.eup %2324  ;;  %vm1571_vm11 = vcmask 1042434   ;;  %v1591_v4 = vrot.slane %v3110_v5, 5  ;;  %vm1573_vm12 = vcmask 1043459   ;;  %vm1575_vm13 = vcmask 1044484  }
 0x34a   : > { %v1296_v8 = vadd.f32 1.0, %v2325_v7  ;;  %vm1577_vm14 = vcmask 1045509   ;;  %vm1579_vm15 = vcmask 1046534   ;;  %vm1581_vm0 = vcmask 1047559  }
 0x34b   : > { %1486 = vrot.lane.b32.xlu1 %v1463_v24, %s2688_s14  ;;  %v2327_v18 = vpop.eup %2326  ;;  %vm1642_vm1 = vcmask 516096  }
 0x34c   : > { %v2329_v33 = vpop.eup %2328  ;;  %v1297_v52 = vadd.f32 1.0, %v2327_v18  ;;  %2340 = vrcp.f32 %v1296_v8 }
 0x34d   : > { %1484 = vrot.lane.b32.xlu0 %v1462_v0, %s2688_s14  ;;  %v1299_v9 = vadd.f32 1.0, %v2329_v33 }
 0x34e   : > { %v2331_v25 = vpop.eup %2330  ;;  %2342 = vrcp.f32 %v1297_v52 }
 0x34f   : > { %v2333_v41 = vpop.eup %2332  ;;  %v1298_v11 = vadd.f32 1.0, %v2331_v25  ;;  %2344 = vrcp.f32 %v1299_v9 }
 0x350   : > { %v2335_v32 = vpop.eup %2334  ;;  %v1301_v12 = vadd.f32 1.0, %v2333_v41 }
 0x351   : > { %v2337_v37 = vpop.eup %2336  ;;  %2346 = vrcp.f32 %v1298_v11  ;;  %v1300_v51 = vadd.f32 1.0, %v2335_v32 }
 0x352   : > { %v2339_v44 = vpop.eup %2338  ;;  %2348 = vrcp.f32 %v1301_v12  ;;  %v1303_v40 = vadd.f32 1.0, %v2337_v37 }
 0x353   : > { %2350 = vrcp.f32 %v1300_v51  ;;  %v1302_v58 = vadd.f32 1.0, %v2339_v44 }
 0x354   : > { %2352 = vrcp.f32 %v1303_v40 }
 0x355   : > { %2354 = vrcp.f32 %v1302_v58 }
 0x356   : > { %v2341_v14 = vpop.eup %2340 }
 0x358   : > { %v2343_v19 = vpop.eup %2342 }
 0x359   : > { %v2345_v23 = vpop.eup %2344 }
 0x35b   : > { %v2347_v16 = vpop.eup %2346 }
 0x35c   : > { %v2349_v45 = vpop.eup %2348 }
 0x35d   : > { %v2351_v49 = vpop.eup %2350 }
 0x35e   : > { %v2353_v24 = vpop.eup %2352 }
 0x35f   : > { %v2355_v21 = vpop.eup %2354 }
 0x3b1   : > { %v1473_v13 = vpop.permute.xlu1 %1472 }
 0x3b2   : > { %v1496_v17 = vmul.f32 %v2341_v14, %v1473_v13 }
 0x3b3   : > { %v1475_v20 = vpop.permute.xlu0 %1474 }
 0x3b4   : > { %v1505_v57 = vsel %vm1504_vm9, %v1496_v17, 0.0  ;;  %v1497_v59 = vmul.f32 %v2343_v19, %v1475_v20 }
 0x3b5   : > { %v1506_v15 = vrot.slane %v1505_v57, 4  ;;  %v1479_v28 = vpop.permute.xlu1 %1478 }
 0x3b6   : > { %v1512_v29 = vsel %vm1504_vm9, %v1497_v59, 0.0  ;;  %v1499_v30 = vmul.f32 %v2345_v23, %v1479_v28 }
 0x3b7   : > { %v1507_v31 = vadd.f32 %v1506_v15, %v1505_v57  ;;  %v1513_v34 = vrot.slane %v1512_v29, 4  ;;  %v1477_v38 = vpop.permute.xlu0 %1476 }
 0x3b8   : > { %v1526_v39 = vsel %vm1504_vm9, %v1499_v30, 0.0  ;;  %v1498_v43 = vmul.f32 %v2347_v16, %v1477_v38  ;;  %v1590_v16 = vrot.slane %v3110_v5, 4 }
 0x3b9   : > { %v1508_v61 = vrot.slane %v1507_v31, 2  ;;  %v1514_v60 = vadd.f32 %v1513_v34, %v1512_v29  ;;  %v1527_v46 = vrot.slane %v1526_v39, 4  ;;  %v1483_v53 = vpop.permute.xlu1 %1482 }
 0x3ba   : > { %v1519_v48 = vsel %vm1504_vm9, %v1498_v43, 0.0  ;;  %v1501_v10 = vmul.f32 %v2349_v45, %v1483_v53 }
 0x3bb   : > { %v1509_v26 = vadd.f32 %v1508_v61, %v1507_v31  ;;  %v1515_v54 = vrot.slane %v1514_v60, 2  ;;  %v1528_v22 = vadd.f32 %v1527_v46, %v1526_v39  ;;  %v1520_v55 = vrot.slane %v1519_v48, 4  ;;  %v1481_v56 = vpop.permute.xlu0 %1480 }
 0x3bc   : > { %v1540_v63 = vsel %vm1504_vm9, %v1501_v10, 0.0  ;;  %v1500_v35 = vmul.f32 %v2351_v49, %v1481_v56 }
 0x3bd   : > { %v1510_v0 = vrot.slane %v1509_v26, 1  ;;  %v1516_v42 = vadd.f32 %v1515_v54, %v1514_v60  ;;  %v1529_v1 = vrot.slane %v1528_v22, 2  ;;  %v1521_v27 = vadd.f32 %v1520_v55, %v1519_v48  ;;  %v1487_v3 = vpop.permute.xlu1 %1486 }
 0x3be   : > { %v1541_v50 = vrot.slane %v1540_v63, 4  ;;  %v1533_v6 = vsel %vm1504_vm9, %v1500_v35, 0.0  ;;  %v1503_v7 = vmul.f32 %v2353_v24, %v1487_v3 }
 0x3bf   : > { %v1511_v18 = vadd.f32 %v1510_v0, %v1509_v26  ;;  %v1517_v8 = vrot.slane %v1516_v42, 1  ;;  %v1530_v33 = vadd.f32 %v1529_v1, %v1528_v22  ;;  %v1522_v52 = vrot.slane %v1521_v27, 2  ;;  %v1485_v25 = vpop.permute.xlu0 %1484 }
 0x3c0   : > { %v1542_v9 = vadd.f32 %v1541_v50, %v1540_v63  ;;  %v1534_v41 = vrot.slane %v1533_v6, 4  ;;  %v1554_v11 = vsel %vm1504_vm9, %v1503_v7, 0.0  ;;  %v1502_v32 = vmul.f32 %v2355_v21, %v1485_v25 }
 0x3c1   : > { %v1518_v12 = vadd.f32 %v1517_v8, %v1516_v42  ;;  %v1531_v37 = vrot.slane %v1530_v33, 1  ;;  %v1523_v51 = vadd.f32 %v1522_v52, %v1521_v27  ;;  %v1602_v44 = vmul.f32 %v3110_v5, %v1511_v18 }
 0x3c2   : > { %v1543_v40 = vrot.slane %v1542_v9, 2  ;;  %v1535_v14 = vadd.f32 %v1534_v41, %v1533_v6  ;;  %v1555_v13 = vrot.slane %v1554_v11, 4  ;;  %v1547_v20 = vsel %vm1504_vm9, %v1502_v32, 0.0 }
 0x3c3   : > { %v1570_v58 = vsel %vm1569_vm10, %v1518_v12, %v1511_v18  ;;  %v1603_v17 = vmul.f32 %v1587_v47, %v1518_v12  ;;  %v1532_v19 = vadd.f32 %v1531_v37, %v1530_v33  ;;  %v1524_v57 = vrot.slane %v1523_v51, 1 }
 0x3c4   : > { %v1544_v59 = vadd.f32 %v1543_v40, %v1542_v9  ;;  %v1536_v23 = vrot.slane %v1535_v14, 2  ;;  %v1556_v15 = vadd.f32 %v1555_v13, %v1554_v11  ;;  %v1645_v43 = vmul.f32 %v1602_v44, %v1602_v44 }
 0x3c5   : > { %v1619_v28 = vrot.slane %v1603_v17, 7  ;;  %v1646_v29 = vmul.f32 %v1603_v17, %v1603_v17  ;;  %v1605_v30 = vmul.f32 %v1589_v62, %v1532_v19  ;;  %v1525_v31 = vadd.f32 %v1524_v57, %v1523_v51 }
 0x3c6   : > { %v1545_v34 = vrot.slane %v1544_v59, 1  ;;  %v1537_v38 = vadd.f32 %v1536_v23, %v1535_v14  ;;  %v1557_v39 = vrot.slane %v1556_v15, 2  ;;  %v1548_v60 = vrot.slane %v1547_v20, 4 }
 0x3c7   : > { %v1620_v45 = vsel %vm1569_vm10, %v1619_v28, %v1602_v44  ;;  %v1661_v61 = vrot.slane %v1646_v29, 7  ;;  %v1572_v46 = vsel %vm1571_vm11, %v1525_v31, %v1570_v58  ;;  %v1604_v53 = vmul.f32 %v1588_v36, %v1525_v31 }
 0x3c8   : > { %v1546_v47 = vadd.f32 %v1545_v34, %v1544_v59  ;;  %v1538_v48 = vrot.slane %v1537_v38, 1  ;;  %v1648_v49 = vmul.f32 %v1605_v30, %v1605_v30  ;;  %v1574_v26 = vsel %vm1573_vm12, %v1532_v19, %v1572_v46 }
 0x3c9   : > { %v1662_v10 = vsel %vm1569_vm10, %v1661_v61, %v1645_v43  ;;  %v1558_v54 = vadd.f32 %v1557_v39, %v1556_v15  ;;  %v1621_v22 = vrot.slane %v1604_v53, 6  ;;  %v1647_v55 = vmul.f32 %v1604_v53, %v1604_v53 }
 0x3ca   : > { %v1607_v56 = vmul.f32 %v1591_v4, %v1546_v47  ;;  %v1539_v62 = vadd.f32 %v1538_v48, %v1537_v38  ;;  %v1623_v63 = vrot.slane %v1605_v30, 5  ;;  %v1549_v24 = vadd.f32 %v1548_v60, %v1547_v20  ;;  %v1610_v48 = vld [vmem:[#allocation4] sm:$0x1] }
 0x3cb   : > { %v1559_v35 = vrot.slane %v1558_v54, 1  ;;  %v1622_v0 = vsel %vm1571_vm11, %v1621_v22, %v1620_v45  ;;  %v1663_v42 = vrot.slane %v1647_v55, 6  ;;  %v1593_v36 = vrot.slane %v3110_v5, 7 }
 0x3cc   : > { %v1665_v1 = vrot.slane %v1648_v49, 5  ;;  %v1576_v27 = vsel %vm1575_vm13, %v1539_v62, %v1574_v26  ;;  %v1606_v3 = vmul.f32 %v1590_v16, %v1539_v62  ;;  %v1624_v50 = vsel %vm1573_vm12, %v1623_v63, %v1622_v0  ;;  %v1644_v26 = vld [vmem:[#allocation5] sm:$0x1] }
 0x3cd   : > { %v1664_v6 = vsel %vm1571_vm11, %v1663_v42, %v1662_v10  ;;  %v1650_v7 = vmul.f32 %v1607_v56, %v1607_v56  ;;  %v1550_v4 = vrot.slane %v1549_v24, 2  ;;  %v1578_v21 = vsel %vm1577_vm14, %v1546_v47, %v1576_v27 }
 0x3ce   : > { %v1625_v18 = vrot.slane %v1606_v3, 4  ;;  %v1649_v8 = vmul.f32 %v1606_v3, %v1606_v3  ;;  %v1666_v33 = vsel %vm1573_vm12, %v1665_v1, %v1664_v6  ;;  %v1560_v52 = vadd.f32 %v1559_v35, %v1558_v54 }
 0x3cf   : > { %v1627_v25 = vrot.slane %v1607_v56, 3  ;;  %v1551_v9 = vadd.f32 %v1550_v4, %v1549_v24  ;;  %v1669_v32 = vrot.slane %v1650_v7, 3  ;;  %v1592_v12 = vrot.slane %v3110_v5, 6 }
 0x3d0   : > { %v1626_v41 = vsel %vm1575_vm13, %v1625_v18, %v1624_v50  ;;  %v1667_v11 = vrot.slane %v1649_v8, 4  ;;  %v1609_v40 = vmul.f32 %v1593_v36, %v1560_v52 }
 0x3d1   : > { %v1552_v37 = vrot.slane %v1551_v9, 1  ;;  %v1628_v51 = vsel %vm1577_vm14, %v1627_v25, %v1626_v41 }
 0x3d2   : > { %v1668_v44 = vsel %vm1575_vm13, %v1667_v11, %v1666_v33  ;;  %v1652_v19 = vmul.f32 %v1609_v40, %v1609_v40  ;;  %v1631_v59 = vrot.slane %v1609_v40, 1 }
 0x3d3   : > { %v1553_v14 = vadd.f32 %v1552_v37, %v1551_v9  ;;  %v1670_v13 = vsel %vm1577_vm14, %v1669_v32, %v1668_v44 }
 0x3d4   : > { %v1673_v28 = vrot.slane %v1652_v19, 1 }
 0x3d5   : > { %v1580_v58 = vsel %vm1579_vm15, %v1553_v14, %v1578_v21  ;;  %v1608_v17 = vmul.f32 %v1592_v12, %v1553_v14 }
 0x3d6   : > { %v1582_v20 = vsel %vm1581_vm0, %v1560_v52, %v1580_v58 }
 0x3d7   : > { %1585 = vst.msk [vmem:[%s1584_s5] sm:$0xff] %vm911_vm7, %v1582_v20  ;;  %v1629_v5 = vrot.slane %v1608_v17, 2  ;;  %v1651_v57 = vmul.f32 %v1608_v17, %v1608_v17 }
 0x3d9   : > { %v1630_v23 = vsel %vm1579_vm15, %v1629_v5, %v1628_v51  ;;  %v1671_v15 = vrot.slane %v1651_v57, 2 }
 0x3da   : > { %v1632_v29 = vsel %vm1581_vm0, %v1631_v59, %v1630_v23 }
 0x3db   : > { %v1634_v30 = vsel %vm911_vm7, %v1632_v29, 0.0  ;;  %v1672_v16 = vsel %vm1579_vm15, %v1671_v15, %v1670_v13 }
 0x3dc   : > { %v1635_v31 = vrot.slane %v1634_v30, 4  ;;  %v1674_v34 = vsel %vm1581_vm0, %v1673_v28, %v1672_v16 }
 0x3dd   : > { %v1676_v38 = vsel %vm911_vm7, %v1674_v34, 0.0 }
 0x3de   : > { %v1636_v39 = vadd.f32 %v1635_v31, %v1634_v30  ;;  %v1677_v43 = vrot.slane %v1676_v38, 4 }
 0x3e0   : > { %v1637_v45 = vrot.slane %v1636_v39, 2  ;;  %v1678_v61 = vadd.f32 %v1677_v43, %v1676_v38 }
 0x3e2   : > { %v1638_v60 = vadd.f32 %v1637_v45, %v1636_v39  ;;  %v1679_v46 = vrot.slane %v1678_v61, 2 }
 0x3e4   : > { %v1639_v53 = vrot.slane %v1638_v60, 1  ;;  %v1680_v47 = vadd.f32 %v1679_v46, %v1678_v61 }
 0x3e6   : > { %v1640_v10 = vadd.f32 %v1639_v53, %v1638_v60  ;;  %v1681_v49 = vrot.slane %v1680_v47, 1 }
 0x3e8   : > { %v1641_v54 = vadd.f32 %v1640_v10, %v1610_v48  ;;  %v1682_v22 = vadd.f32 %v1681_v49, %v1680_v47 }
 0x3ea   : > { %1643 = vst.msk [vmem:[#allocation4] sm:$0x1] %vm1642_vm1, %v1641_v54  ;;  %v1683_v55 = vadd.f32 %v1682_v22, %v1644_v26 }
 0x3ec   : > { %1684 = vst.msk [vmem:[#allocation5] sm:$0x1] %vm1642_vm1, %v1683_v55 }
 0x3ed PF: > { %s3610_s7 = sld [smem:[#allocation27_spill]] }
 0x3f3   : > { %p1962_p10 = scmp.ne.s32.totalorder %s3610_s7, 2 }
 0x3f4   : > { %v1689_v56 = vld [vmem:[#allocation4] sm:$0x1] (!%p1962_p10)  ;;  %v1691_v62 = vld [vmem:[#allocation5] sm:$0x1] (!%p1962_p10)  ;;  %v1702_v36 = vsub.s32 (!%p1962_p10), 0, %v3104_v2  ;;  %s1697_s26 = scalar_lea.vmem (!%p1962_p10), [#allocation6], %s3096_s15 }
 0x3f5   : > { %1688 = sbr.rel (%p1962_p10) target bundleno = 1113 (0x459), region = 84  ;;  %v1690_v63 = vmul.f32 (!%p1962_p10), 0.05, %v1689_v56  ;;  %v1692_v35 = vmul.f32 (!%p1962_p10), 0.05, %v1691_v62  ;;  %v1698_v27 = vld [vmem:[%s1697_s26] sm:$0xff] (!%p1962_p10) }
 0x3f6   : > { %v1713_v7 = vld [vmem:[%s3074_s21] sm:$0xff] (!%p1962_p10)  ;;  %vm1752_vm5 = vcmask (!%p1962_p10), 523264  }
 0x3f7   : > { %v1693_v24 = vmul.f32 (!%p1962_p10), %v1690_v63, %v1690_v63  ;;  %v1703_v1 = vrot.slane (!%p1962_p10), %v1690_v63, %v1702_v36 }
 0x3f9   : > { %v1694_v0 = vsub.f32 (!%p1962_p10), %v1692_v35, %v1693_v24  ;;  %v1705_v3 = vsub.f32 (!%p1962_p10), %v1698_v27, %v1703_v1 }
 0x3fb   : > { %v1695_v42 = vadd.f32 (!%p1962_p10), 1e-05, %v1694_v0 }
 0x3fd   : > { %2356 = vrsqrt.f32 %v1695_v42 }
 0x407   : > { %v2357_v50 = vpop.eup %2356 }
 0x408   : > { %v1710_v6 = vrot.slane %v2357_v50, %v1702_v36 }
 0x40a   : > { %v1712_v4 = vmul.f32 %v1710_v6, %v1705_v3 }
 0x40c   : > { %v1714_v21 = vadd.f32 %v1713_v7, %v1712_v4 }
 0x40e   : > { %v1718_v18 = vand.u32 2147483647, %v1714_v21  ;;  %v1715_v12 = vmax.f32 %v1714_v21, 0.0  ;;  %vm1716_vm2 = vcmp.ne.f32.partialorder %v1714_v21, %v1714_v21 }
 0x410   : > { %v1719_v8 = vsub.f32 0.0, %v1718_v18 }
 0x412   : > { %v1720_v33 = vmul.f32 1.442695, %v1719_v8 }
 0x414   : > { %2358 = vpow2.f32 %v1720_v33 }
 0x41e   : > { %v2359_v52 = vpop.eup %2358 }
 0x41f   : > { %v1722_v25 = vadd.f32 1.0, %v2359_v52  ;;  %v1725_v9 = vmul.f32 -0.5, %v2359_v52  ;;  %v1728_v11 = vand.u32 2147483647, %v2359_v52 }
 0x421   : > { %2360 = vlog2.f32 %v1722_v25  ;;  %v1726_v41 = vadd.f32 1.0, %v1725_v9  ;;  %vm1729_vm7 = vcmp.lt.f32.partialorder %v1728_v11, 0.0004427343 }
 0x423   : > { %v1727_v2 = vmul.f32 %v2359_v52, %v1726_v41 }
 0x42b   : > { %v2361_v32 = vpop.eup %2360 }
 0x42c   : > { %v1724_v37 = vmul.f32 0.6931472, %v2361_v32 }
 0x42e   : > { %v1730_v51 = vsel %vm1729_vm7, %v1727_v2, %v1724_v37 }
 0x42f   : > { %v1731_v44 = vadd.f32 %v1730_v51, %v1715_v12 }
 0x431   : > { %v1732_v40 = vsel %vm1716_vm2, %v1714_v21, %v1731_v44 }
 0x432   : > { %v1733_v14 = vadd.f32 %v1732_v40, %v1713_v7 }
 0x434   : > { %v1737_v13 = vand.u32 2147483647, %v1733_v14  ;;  %v1734_v28 = vmax.f32 %v1733_v14, 0.0  ;;  %vm1735_vm4 = vcmp.ne.f32.partialorder %v1733_v14, %v1733_v14 }
 0x436   : > { %v1738_v58 = vsub.f32 0.0, %v1737_v13 }
 0x438   : > { %v1739_v17 = vmul.f32 1.442695, %v1738_v58 }
 0x43a   : > { %2362 = vpow2.f32 %v1739_v17 }
 0x444   : > { %v2363_v19 = vpop.eup %2362 }
 0x445   : > { %v1741_v20 = vadd.f32 1.0, %v2363_v19  ;;  %v1744_v5 = vmul.f32 -0.5, %v2363_v19  ;;  %v1747_v59 = vand.u32 2147483647, %v2363_v19 }
 0x447   : > { %2364 = vlog2.f32 %v1741_v20  ;;  %v1745_v57 = vadd.f32 1.0, %v1744_v5  ;;  %vm1748_vm3 = vcmp.lt.f32.partialorder %v1747_v59, 0.0004427343 }
 0x449   : > { %v1746_v23 = vmul.f32 %v2363_v19, %v1745_v57 }
 0x451   : > { %v2365_v15 = vpop.eup %2364 }
 0x452   : > { %v1743_v29 = vmul.f32 0.6931472, %v2365_v15 }
 0x454   : > { %v1749_v30 = vsel %vm1748_vm3, %v1746_v23, %v1743_v29 }
 0x455   : > { %v1750_v16 = vadd.f32 %v1749_v30, %v1734_v28 }
 0x457   : > { %v1751_v31 = vsel %vm1735_vm4, %v1733_v14, %v1750_v16 }
 0x458   : > { %1753 = vst.msk [vmem:[%s400_s11] sm:$0xff] %vm1752_vm5, %v1751_v31 }
 0x459 PF: > { %s3611_s21 = sld [smem:[#allocation27_spill]]  ;;  %s3612_s18 = sld [smem:[#allocation26_spill]] }
 0x45a   : > { %s3614_s20 = sld [smem:[#allocation30_spill]]  ;;  %s1770_s15 = sshll.u32 %s400_s11, 4  ;;  %s3426_s15 = int_to_ptr.vmem [resolvable:$true] %s1770_s15 }
 0x45b   : > { %s3615_s24 = sld [smem:[#allocation40_spill]]  ;;  %s1755_s1 = scalar_lea.sflag [#allocation9], %s398_s19 }
 0x45c   : > { %s2512_s27 = scalar_lea.vmem %s3426_s15, 128  ;;  %s2689_s17 = smov [#allocation16]  }
 0x45d   : > { %p2513_p1 = scmp.ne.s32.totalorder %s3426_s15, %s2512_s27  ;;  %s2516_s11 = sshll.u32 %s2689_s17, 4  ;;  %s2517_s11 = int_to_ptr.vmem [resolvable:$false] %s2516_s11 }
 0x45e   : > { %s2518_s23 = scalar_lea.vmem %s2517_s11, 256  ;;  %p2519_p11 = scmp.lt.s32.totalorder %s3426_s15, %s2517_s11 }
 0x45f   : > { %p1762_p13 = scmp.eq.s32.totalorder %s3611_s21, 2  ;;  %p2520_p6 = scmp.lt.s32.totalorder %s2518_s23, %s2512_s27 }
 0x460   : > { %p3617_p2 = scmp.ne.s32.totalorder %s3614_s20, 0 }
 0x461   : > { %s3643_s18 = smov (!%p1762_p13, %s3612_s18), 0  ;;  %s3616_s3 = smov %s3615_s24 }
 0x462   : > { %s1964_s6 = sshll.u32 %s3643_s18, 7  ;;  %p2514_p7 = pnand %p2513_p1, %p3617_p2 }
 0x463   : > { %s1768_s22 = scalar_lea.hbm %s3615_s24, %s1964_s6  ;;  %p2521_p8 = por %p2520_p6, %p2519_p11 }
 0x464   : > { %p2515_p4 = pneg %p2514_p7 }
 0x466   : > { %p2522_p0 = pnand %p2521_p8, %p2515_p4 }
 0x468   : > { %2525 = shalt.err (!%p2522_p0)
}
 0x469   : > { %s2526_s25 = scalar_lea.hbm %s1768_s22, 128  ;;  %s2530_s5 = scalar_lea.hbm %s3616_s3, 384 }
 0x46a   : > { %p2527_p9 = scmp.ne.s32.totalorder %s1768_s22, %s2526_s25  ;;  %p2531_p5 = scmp.lt.u32.totalorder %s1768_s22, %s3616_s3 }
 0x46b   : > { %p2532_p10 = scmp.lt.u32.totalorder %s2530_s5, %s2526_s25  ;;  %p2534_p1 = scmp.lt.u32.totalorder %s2526_s25, %s1768_s22 }
 0x46c   : > { %p2528_p3 = pnand %p2527_p9, %p3617_p2 }
 0x46d   : > { %p2533_p13 = por %p2532_p10, %p2531_p5 }
 0x46e   : > { %p2529_p12 = pneg %p2528_p3 }
 0x46f   : > { %p2535_p7 = por %p2534_p1, %p2533_p13 }
 0x471   : > { %p2536_p4 = pnand %p2535_p7, %p2529_p12 }
 0x473   : > { %2539 = shalt.err (!%p2536_p4)
}
 0x474   : > { %2123 = dma.vmem_to_hbm [thread:$0]  (%p3617_p2), %s3426_s15, 128, %s1768_s22, %s1755_s1  }
 0x475 PF: > { %s3618_s21 = sld [smem:[#allocation21_spill]]  ;;  %s3619_s18 = sld [smem:[#allocation31_spill]] }
 0x476   : > { %p2151_p11 = scmp.ge.s32.totalorder %s2666_s10, 2 }
 0x47b   : > { %s1782_s30 = sand.u32 1, %s3618_s21   ;;  %p3620_p6 = scmp.ne.s32.totalorder %s3619_s18, 0 }
 0x47c   : > { %s1783_s6 = scalar_lea.sflag [#allocation9], %s1782_s30 }
 0x47d   : > { %p2143_p8 = pnand %p2151_p11, %p3620_p6 }
 0x47f   : > { %2609 = dma.done.wait (!%p2143_p8), %s1783_s6, 128  }
 0x480   : > { %2611 = vsyncadd (!%p2143_p8), %s1783_s6, 4294967168  ;;  %s26_s10 = sadd.s32 1, %s2666_s10   ;;  %s3622_s21 = sld [smem:[#allocation22_spill]] }
 0x481   : > { %p3454_p0 = scmp.ge.s32.totalorder %s26_s10, 11   ;;  %s3623_s22 = sld [smem:[#allocation23_spill]] }
 0x482   : > { %s3624_s23 = sld [smem:[#allocation35_spill]]  ;;  %s3625_s24 = sld [smem:[#allocation24_spill]] }
 0x483   : > { %s3626_s25 = sld [smem:[#allocation25_spill]]  ;;  %s3627_s26 = sld [smem:[#allocation34_spill]] }
 0x484   : > { %s3628_s7 = sld [smem:[#allocation28_spill]]  ;;  %s3629_s20 = sld [smem:[#allocation33_spill]] }
 0x485   : > { %s3630_s27 = smov %s2642_s28  ;;  %s3631_s28 = smov %s2646_s29 }
 0x486   : > { %s3632_s29 = smov %s2991_s9  ;;  %s3633_s30 = smov %s2658_s8 }
 0x487   : > { %s3634_s8 = smov %s3637_s12  ;;  %25 = sbr.rel (!%p3454_p0) target bundleno = 19 (0x13), region = 143 }
 0x48a   : > { %s3635_s9 = smov %s3629_s20 }
 0x48e   :  { %1788 = vsyncpa [#allocation8], 1 }
 0x48f   :  { %1790 = vsyncpa [#allocation8 + $0x1], 1 }
 0x490   :  { %1791 = vsyncpa [#allocation11], 1 }
 0x491   :  { %1793 = vsyncpa [#allocation11 + $0x1], 1 }
 0x492   :  { %1794 = vsyncpa [#allocation14], 1 }
 0x493   :  { %1795 = vsyncpa [#allocation9], 1 }
 0x494   :  { %1797 = vsyncpa [#allocation9 + $0x1], 1 }

</bundles_post_ra>
